<compile_context>
chip_gen: v7x
topology: tpu7x:2x2x1
jax: 0.10.0
libtpu: 0.0.40
codegen_flags: <defaults>
</compile_context>

<pallas_src>
import functools

import jax
import jax.numpy as jnp
from jax.experimental import pallas as pl
from jax.experimental.pallas import tpu as pltpu


# ----------------------------------------------------------------------------
# Pallas kernel 1: hoisted input projection, layer 0 (both directions fused).
#   g = x @ [W_ih_f | W_ih_b] + [b_f | b_b]    -> gx_f, gx_b (bf16)
# ----------------------------------------------------------------------------
def _proj0_kernel(x_ref, w_ref, b_ref, gxf_ref, gxb_ref):
    x = x_ref[...].astype(jnp.bfloat16)                        # (TM, In)
    g = jnp.dot(x, w_ref[...], preferred_element_type=jnp.float32) + b_ref[...]
    g4 = gxf_ref.shape[-1]
    gxf_ref[...] = g[:, :g4].astype(gxf_ref.dtype)
    gxb_ref[...] = g[:, g4:].astype(gxb_ref.dtype)


# ----------------------------------------------------------------------------
# Pallas kernel 2: hoisted input projection for layers > 0 (both dirs fused).
# Consumes the two direction halves separately (no (S,B,2H) concat in HBM);
# one deep-K matmul: concat([xf, xb]) @ (2H, 8H).
# ----------------------------------------------------------------------------
def _proj_pair_kernel(xf_ref, xb_ref, w_ref, b_ref, gxf_ref, gxb_ref):
    xcat = jnp.concatenate([xf_ref[...], xb_ref[...]],
                           axis=-1).astype(jnp.bfloat16)       # (TM, 2H)
    g = jnp.dot(xcat, w_ref[...], preferred_element_type=jnp.float32) + b_ref[...]
    g4 = gxf_ref.shape[-1]
    gxf_ref[...] = g[:, :g4].astype(gxf_ref.dtype)
    gxb_ref[...] = g[:, g4:].astype(gxb_ref.dtype)


def _pick_tm(rows, max_tm=512):
    if rows <= max_tm:
        return rows
    for tm in (512, 256, 128, 64, 32, 16, 8):
        if rows % tm == 0:
            return tm
    return rows  # fallback: single block


_PROJ_COMPILER_PARAMS = pltpu.CompilerParams(
    dimension_semantics=("parallel",),
    vmem_limit_bytes=32 * 1024 * 1024)


def project_layer0(x2d, w_cat, b_cat):
    rows, in_dim = x2d.shape
    g8 = w_cat.shape[1]
    g4 = g8 // 2
    tm = _pick_tm(rows)
    return pl.pallas_call(
        _proj0_kernel,
        out_shape=(jax.ShapeDtypeStruct((rows, g4), jnp.bfloat16),
                   jax.ShapeDtypeStruct((rows, g4), jnp.bfloat16)),
        grid_spec=pltpu.PrefetchScalarGridSpec(
            num_scalar_prefetch=0,
            grid=(rows // tm,),
            in_specs=[
                pl.BlockSpec((tm, in_dim), lambda i: (i, 0)),
                pl.BlockSpec((in_dim, g8), lambda i: (0, 0)),
                pl.BlockSpec((1, g8), lambda i: (0, 0)),
            ],
            out_specs=[
                pl.BlockSpec((tm, g4), lambda i: (i, 0)),
                pl.BlockSpec((tm, g4), lambda i: (i, 0)),
            ],
        ),
        compiler_params=_PROJ_COMPILER_PARAMS,
    )(x2d, w_cat, b_cat)


def project_pair(xf2d, xb2d, w_cat, b_cat):
    rows, h = xf2d.shape
    g8 = w_cat.shape[1]
    g4 = g8 // 2
    tm = _pick_tm(rows)
    return pl.pallas_call(
        _proj_pair_kernel,
        out_shape=(jax.ShapeDtypeStruct((rows, g4), jnp.bfloat16),
                   jax.ShapeDtypeStruct((rows, g4), jnp.bfloat16)),
        grid_spec=pltpu.PrefetchScalarGridSpec(
            num_scalar_prefetch=0,
            grid=(rows // tm,),
            in_specs=[
                pl.BlockSpec((tm, h), lambda i: (i, 0)),
                pl.BlockSpec((tm, h), lambda i: (i, 0)),
                pl.BlockSpec((2 * h, g8), lambda i: (0, 0)),
                pl.BlockSpec((1, g8), lambda i: (0, 0)),
            ],
            out_specs=[
                pl.BlockSpec((tm, g4), lambda i: (i, 0)),
                pl.BlockSpec((tm, g4), lambda i: (i, 0)),
            ],
        ),
        compiler_params=_PROJ_COMPILER_PARAMS,
    )(xf2d, xb2d, w_cat, b_cat)


# ----------------------------------------------------------------------------
# Pallas kernel 3: fused bidirectional recurrent scan.
# grid=(S//T,), T timesteps per grid step, both directions per step.
# Per timestep: ONE recurrent matmul [h_f|h_b](B,2H) @ block-diag W_hh(2H,8H),
# wide-slab nonlinearities. Per-direction gate column order is [i, f, o, g]
# (sigmoid gates contiguous, tanh gate last); gx arrives precomputed in bf16.
# ----------------------------------------------------------------------------
def _bilstm_scan_kernel(gxf_ref, gxb_ref, whh_ref, outf_ref, outb_ref,
                        h_scr, c_scr):
    blk = pl.program_id(0)

    @pl.when(blk == 0)
    def _():
        h_scr[...] = jnp.zeros_like(h_scr)
        c_scr[...] = jnp.zeros_like(c_scr)

    H = outf_ref.shape[-1]
    T = gxf_ref.shape[0]
    G4 = 4 * H
    whh = whh_ref[...]                       # (2H, 8H) bf16, hoisted load

    def step(j, carry):
        h_cat = h_scr[...]                   # (B, 2H) f32  = [h_f | h_b]
        c_cat = c_scr[...]                   # (B, 2H) f32  = [c_f | c_b]
        # Single recurrent matmul for both directions (block-diagonal W_hh).
        ghh = jnp.dot(h_cat.astype(jnp.bfloat16), whh,
                      preferred_element_type=jnp.float32)      # (B, 8H)
        jb = T - 1 - j
        g_f = gxf_ref[j].astype(jnp.float32) + ghh[:, :G4]     # fwd, time j
        g_b = gxb_ref[jb].astype(jnp.float32) + ghh[:, G4:]    # bwd, time jb
        # Batched activations: one sigmoid over [i,f,o], one tanh over [g].
        sf = jax.nn.sigmoid(g_f[:, :3 * H])
        gf = jnp.tanh(g_f[:, 3 * H:])
        sb = jax.nn.sigmoid(g_b[:, :3 * H])
        gb = jnp.tanh(g_b[:, 3 * H:])
        c_f = sf[:, H:2 * H] * c_cat[:, :H] + sf[:, :H] * gf
        c_b = sb[:, H:2 * H] * c_cat[:, H:] + sb[:, :H] * gb
        c_new = jnp.concatenate([c_f, c_b], axis=-1)
        o_cat = jnp.concatenate([sf[:, 2 * H:3 * H], sb[:, 2 * H:3 * H]], axis=-1)
        h_new = o_cat * jnp.tanh(c_new)      # one tanh over the combined state
        c_scr[...] = c_new
        h_scr[...] = h_new
        outf_ref[j] = h_new[:, :H]
        outb_ref[jb] = h_new[:, H:]
        return carry

    jax.lax.fori_loop(0, T, step, 0, unroll=True)


def _pick_block_t(S, B, H, budget_bytes=8 << 20, max_t=32):
    # Per-timestep VMEM in the pipeline: 2 dirs x 2 bufs x B*4H bf16 (gx)
    #                                  + 2 dirs x 2 bufs x B*H  f32  (out).
    per_t = 2 * 2 * B * 4 * H * 2 + 2 * 2 * B * H * 4
    cap = max(1, min(S, max_t, budget_bytes // max(per_t, 1)))
    for t in range(cap, 0, -1):
        if S % t == 0:
            return t
    return 1


def bilstm_scan(gx_f, gx_b, w_hh_cat):
    """gx_f/gx_b: (S, B, 4H) bf16 precomputed x-gates -> (out_f, out_b) f32."""
    S, B, G4 = gx_f.shape
    H = G4 // 4
    T = _pick_block_t(S, B, H)
    nblk = S // T

    fwd_idx = lambda i: (i, 0, 0)
    bwd_idx = lambda i: (nblk - 1 - i, 0, 0)

    # TODO(synk): on v7x the two directions could be split across the two
    # TensorCores (leading core-parallel grid axis); kept fused single-core here.
    return pl.pallas_call(
        _bilstm_scan_kernel,
        out_shape=(jax.ShapeDtypeStruct((S, B, H), jnp.float32),
                   jax.ShapeDtypeStruct((S, B, H), jnp.float32)),
        grid_spec=pltpu.PrefetchScalarGridSpec(
            num_scalar_prefetch=0,
            grid=(nblk,),
            in_specs=[
                pl.BlockSpec((T, B, G4), fwd_idx),
                pl.BlockSpec((T, B, G4), bwd_idx),
                pl.BlockSpec((2 * H, 2 * G4), lambda i: (0, 0)),  # bf16 W_hh
            ],
            out_specs=[
                pl.BlockSpec((T, B, H), fwd_idx),
                pl.BlockSpec((T, B, H), bwd_idx),
            ],
            scratch_shapes=[pltpu.VMEM((B, 2 * H), jnp.float32),   # h = [h_f|h_b]
                            pltpu.VMEM((B, 2 * H), jnp.float32)],  # c = [c_f|c_b]
        ),
        compiler_params=pltpu.CompilerParams(
            dimension_semantics=("arbitrary",),        # sequential recurrence
            vmem_limit_bytes=32 * 1024 * 1024),
    )(gx_f, gx_b, w_hh_cat)


# ----------------------------------------------------------------------------
# Pallas kernel 4: fused head — LayerNorm (on gathered rows only) + collapsed
# Batch_Net_large (single matmul; BN folded, LeakyReLU(slope=1) removed) + MSE.
# ----------------------------------------------------------------------------
def _head_kernel(x_ref, y_ref, g_ref, bt_ref, w_ref, b_ref, logits_ref, loss_ref):
    x = x_ref[...]                                             # (B, 2H)
    mean = jnp.mean(x, axis=-1, keepdims=True)
    var = jnp.mean((x - mean) * (x - mean), axis=-1, keepdims=True)
    xn = (x - mean) * jax.lax.rsqrt(var + 1e-5) * g_ref[...] + bt_ref[...]
    logits = jnp.dot(xn, w_ref[...], preferred_element_type=jnp.float32) + b_ref[...]
    logits_ref[...] = logits
    d = logits - y_ref[...]
    loss_ref[...] = jnp.reshape(jnp.mean(d * d), (1, 1))


def head_ln_fc_loss(sen, y, gamma, beta, w_head, b_head):
    B = sen.shape[0]
    L = w_head.shape[1]
    return pl.pallas_call(
        _head_kernel,
        out_shape=(jax.ShapeDtypeStruct((B, L), jnp.float32),
                   jax.ShapeDtypeStruct((1, 1), jnp.float32)),
    )(sen, y, gamma, beta, w_head, b_head)


# ----------------------------------------------------------------------------
# Full RNNModel forward (eval mode).
# ----------------------------------------------------------------------------
def rnn_model_forward(params, inputs_ids, input_mask, labels):
    B, S = inputs_ids.shape
    H = params["lstm"][0]["w_hh_cat"].shape[0] // 2

    # Embedding lookup + SpatialDropout (identity in eval) + mask.
    embs = jnp.take(params["embedding"], inputs_ids, axis=0)          # (B, S, E)
    # TODO(synk): SpatialDropout / Dropout / inter-layer LSTM dropout are
    # identity in eval mode; training-mode stochastic dropout is not implemented.
    embs = embs * input_mask.astype(jnp.float32)[:, :, None]

    # Time-major for the recurrent kernels.
    x_tm = jnp.transpose(embs, (1, 0, 2)).astype(jnp.float32)         # (S, B, E)

    out_f = out_b = None
    for li, layer in enumerate(params["lstm"]):
        if li == 0:
            gx_f, gx_b = project_layer0(x_tm.reshape(S * B, -1),
                                        layer["w_ih_cat"], layer["b_cat"])
        else:
            gx_f, gx_b = project_pair(out_f.reshape(S * B, H),
                                      out_b.reshape(S * B, H),
                                      layer["w_ih_cat"], layer["b_cat"])
        out_f, out_b = bilstm_scan(gx_f.reshape(S, B, 4 * H),
                                   gx_b.reshape(S, B, 4 * H),
                                   layer["w_hh_cat"])

    # Gather the one row per batch element BEFORE LayerNorm (LN is row-wise,
    # so gather-then-LN == LN-then-gather):
    # token_embeddings = seq_out[:, 1:-1, :] -> global time = labels[:, 0] + 1.
    pos = labels[:, 0] + 1                                            # (B,)
    rows = jnp.arange(B)
    sen = jnp.concatenate([out_f[pos, rows, :], out_b[pos, rows, :]], axis=-1)
    new_labels = labels[:, 1:].astype(jnp.float32)                    # (B, num_labels)
    # dropout_fc is identity in eval mode.

    logits, loss = head_ln_fc_loss(sen, new_labels,
                                   params["ln_gamma"], params["ln_beta"],
                                   params["fc_w"], params["fc_b"])
    return logits, loss[0, 0]


# ----------------------------------------------------------------------------
# Parameter construction: torch-equivalent layout first, then a one-time
# host-side prep into the fused / reordered / bf16 kernel layout.
# ----------------------------------------------------------------------------
def make_torch_like_params(key, vocab_size, emb_size, hidden_size, num_layer,
                           fc_size, num_labels):
    keys = iter(jax.random.split(key, 256))
    nrm = lambda shape, s=0.1: (s * jax.random.normal(next(keys), shape)
                                ).astype(jnp.float32)

    p = {"embedding": nrm((vocab_size, emb_size), 0.5)}

    lstm = []
    for layer in range(num_layer):
        in_dim = emb_size if layer == 0 else 2 * hidden_size
        lstm.append({
            # torch W_ih: (4H, in), W_hh: (4H, H) stored transposed here;
            # gate order i, f, g, o; b = b_ih + b_hh folded per direction.
            "w_ih_f": nrm((in_dim, 4 * hidden_size)),
            "w_ih_b": nrm((in_dim, 4 * hidden_size)),
            "w_hh_f": nrm((hidden_size, 4 * hidden_size)),
            "w_hh_b": nrm((hidden_size, 4 * hidden_size)),
            "b_f": nrm((1, 4 * hidden_size)),
            "b_b": nrm((1, 4 * hidden_size)),
        })
    p["lstm"] = lstm

    p["ln_gamma"] = (1.0 + nrm((1, 2 * hidden_size))).astype(jnp.float32)
    p["ln_beta"] = nrm((1, 2 * hidden_size))

    fc_half = fc_size // 2
    def lin(i, o): return nrm((i, o)), nrm((1, o))
    def bn(o):
        return ((1.0 + nrm((1, o))).astype(jnp.float32), nrm((1, o)),
                jnp.zeros((1, o), jnp.float32), jnp.ones((1, o), jnp.float32))
    p["fc1_w"], p["fc1_b"] = lin(2 * hidden_size, fc_size)
    p["bn1_g"], p["bn1_b"], p["bn1_m"], p["bn1_v"] = bn(fc_size)
    p["fc2_w"], p["fc2_b"] = lin(fc_size, fc_half)
    p["bn2_g"], p["bn2_b"], p["bn2_m"], p["bn2_v"] = bn(fc_half)
    p["fc3_w"], p["fc3_b"] = lin(fc_half, num_labels)
    return p


def _reorder_ifgo_to_ifog(w, H):
    # torch gate column order [i, f, g, o] -> kernel order [i, f, o, g]
    return jnp.concatenate([w[..., :2 * H], w[..., 3 * H:4 * H],
                            w[..., 2 * H:3 * H]], axis=-1)


def prepare_kernel_params(p, hidden_size):
    H = hidden_size
    kp = {"embedding": p["embedding"]}

    layers = []
    for layer in p["lstm"]:
        wf = _reorder_ifgo_to_ifog(layer["w_ih_f"], H)
        wb = _reorder_ifgo_to_ifog(layer["w_ih_b"], H)
        w_ih_cat = jnp.concatenate([wf, wb], axis=1).astype(jnp.bfloat16)  # (In, 8H)
        b_cat = jnp.concatenate([_reorder_ifgo_to_ifog(layer["b_f"], H),
                                 _reorder_ifgo_to_ifog(layer["b_b"], H)],
                                axis=1)                                    # (1, 8H) f32
        whh_f = _reorder_ifgo_to_ifog(layer["w_hh_f"], H)
        whh_b = _reorder_ifgo_to_ifog(layer["w_hh_b"], H)
        w_hh_cat = jnp.zeros((2 * H, 8 * H), jnp.float32)
        w_hh_cat = w_hh_cat.at[:H, :4 * H].set(whh_f)      # h_f -> fwd gates
        w_hh_cat = w_hh_cat.at[H:, 4 * H:].set(whh_b)      # h_b -> bwd gates
        layers.append({"w_ih_cat": w_ih_cat, "b_cat": b_cat,
                       "w_hh_cat": w_hh_cat.astype(jnp.bfloat16)})
    kp["lstm"] = layers

    kp["ln_gamma"] = p["ln_gamma"]
    kp["ln_beta"] = p["ln_beta"]

    # Batch_Net_large in eval mode: fold BatchNorm into the Linears, drop the
    # identity LeakyReLU(slope=1.0), then collapse the three Linears into one.
    eps = 1e-5
    def fold(w, b, g, beta, m, v):
        s = g / jnp.sqrt(v + eps)
        return w * s, (b - m) * s + beta
    w1, b1 = fold(p["fc1_w"], p["fc1_b"], p["bn1_g"], p["bn1_b"], p["bn1_m"], p["bn1_v"])
    w2, b2 = fold(p["fc2_w"], p["fc2_b"], p["bn2_g"], p["bn2_b"], p["bn2_m"], p["bn2_v"])
    w3, b3 = p["fc3_w"], p["fc3_b"]
    kp["fc_w"] = w1 @ w2 @ w3                              # (2H, num_labels)
    kp["fc_b"] = (b1 @ w2 + b2) @ w3 + b3                  # (1, num_labels)
    return kp


if __name__ == "__main__":
    # Small config consistent with RNNModel(vocab, emb, hidden, layers, fc, 'LSTM', labels).
    vocab_size, emb_size, hidden_size = 50, 16, 32
    num_layer, fc_size, num_labels = 2, 64, 8
    B, S = 2, 8

    key = jax.random.PRNGKey(0)
    k_par, k_ids, k_lab = jax.random.split(key, 3)

    torch_params = make_torch_like_params(k_par, vocab_size, emb_size,
                                          hidden_size, num_layer, fc_size,
                                          num_labels)
    params = prepare_kernel_params(torch_params, hidden_size)

    inputs_ids = jax.random.randint(k_ids, (B, S), 0, vocab_size, dtype=jnp.int32)
    input_mask = jnp.ones((B, S), dtype=jnp.int32)
    # labels: col 0 = position of the number token (indexes seq_out[:,1:-1,:]),
    # cols 1: = regression targets -> (B, num_labels + 1)
    pos = jax.random.randint(k_lab, (B, 1), 0, S - 2, dtype=jnp.int32)
    targets = jax.random.randint(jax.random.fold_in(k_lab, 1),
                                 (B, num_labels), 0, 5, dtype=jnp.int32)
    labels = jnp.concatenate([pos, targets], axis=1)

    fwd = jax.jit(functools.partial(rnn_model_forward, params))
    logits, loss = fwd(inputs_ids, input_mask, labels)
    jax.block_until_ready((logits, loss))

    assert logits.shape == (B, num_labels)
    assert loss.shape == ()
    print("KERNEL_OK")
</pallas_src>

<mosaic_0001>
module attributes {stable_mosaic.version = 11 : i64} {
  func.func @_proj0_kernel(%arg0: i32, %arg1: memref<16x16xf32, #tpu.memory_space<vmem>>, %arg2: memref<16x256xbf16, #tpu.memory_space<vmem>>, %arg3: memref<1x256xf32, #tpu.memory_space<vmem>>, %arg4: memref<16x128xbf16, #tpu.memory_space<vmem>>, %arg5: memref<16x128xbf16, #tpu.memory_space<vmem>>) attributes {dimension_semantics = [#tpu.dimension_semantics<parallel>], iteration_bounds = array<i64: 1>, scalar_prefetch = 0 : i64, scratch_operands = 0 : i64, tpu.core_type = #tpu.core_type<tc>, window_params = [{transform_indices = @transform_0, window_bounds = array<i64: 16, 16>}, {pipeline_mode = #tpu.pipeline_mode<synchronous>, transform_indices = @transform_1, window_bounds = array<i64: 16, 256>}, {pipeline_mode = #tpu.pipeline_mode<synchronous>, transform_indices = @transform_2, window_bounds = array<i64: 1, 256>}, {transform_indices = @transform_3, window_bounds = array<i64: 16, 128>}, {transform_indices = @transform_4, window_bounds = array<i64: 16, 128>}]} {
    %c0 = arith.constant 0 : index
    %c0_0 = arith.constant 0 : index
    %0 = vector.load %arg1[%c0, %c0_0] : memref<16x16xf32, #tpu.memory_space<vmem>>, vector<16x16xf32>
    %1 = arith.truncf %0 : vector<16x16xf32> to vector<16x16xbf16>
    %c0_1 = arith.constant 0 : index
    %c0_2 = arith.constant 0 : index
    %2 = vector.load %arg2[%c0_1, %c0_2] : memref<16x256xbf16, #tpu.memory_space<vmem>>, vector<16x256xbf16>
    %cst = arith.constant dense<0.000000e+00> : vector<16x256xf32>
    %3 = tpu.matmul %1, %2, %cst {dimension_numbers = #tpu.dot_dimension_numbers<[1], [0], [0], [1], [0, 0, 1, 1], [], []>} : vector<16x16xbf16>, vector<16x256xbf16>, vector<16x256xf32> -> vector<16x256xf32>
    %c0_3 = arith.constant 0 : index
    %c0_4 = arith.constant 0 : index
    %4 = vector.load %arg3[%c0_3, %c0_4] : memref<1x256xf32, #tpu.memory_space<vmem>>, vector<1x256xf32>
    %5 = vector.broadcast %4 : vector<1x256xf32> to vector<16x256xf32>
    %6 = arith.addf %3, %5 : vector<16x256xf32>
    %7 = vector.extract_strided_slice %6 {offsets = [0, 0], sizes = [16, 128], strides = [1, 1]} : vector<16x256xf32> to vector<16x128xf32>
    %8 = arith.truncf %7 : vector<16x128xf32> to vector<16x128xbf16>
    %c0_5 = arith.constant 0 : index
    %c0_6 = arith.constant 0 : index
    %9 = vector.load %arg4[%c0_5, %c0_6] : memref<16x128xbf16, #tpu.memory_space<vmem>>, vector<16x128xbf16>
    tpu.vector_store %arg4[%c0_5, %c0_6], %8 {strides = array<i32>} : memref<16x128xbf16, #tpu.memory_space<vmem>>, vector<16x128xbf16>,
    %10 = vector.extract_strided_slice %6 {offsets = [0, 128], sizes = [16, 128], strides = [1, 1]} : vector<16x256xf32> to vector<16x128xf32>
    %11 = arith.truncf %10 : vector<16x128xf32> to vector<16x128xbf16>
    %c0_7 = arith.constant 0 : index
    %c0_8 = arith.constant 0 : index
    %12 = vector.load %arg5[%c0_7, %c0_8] : memref<16x128xbf16, #tpu.memory_space<vmem>>, vector<16x128xbf16>
    tpu.vector_store %arg5[%c0_7, %c0_8], %11 {strides = array<i32>} : memref<16x128xbf16, #tpu.memory_space<vmem>>, vector<16x128xbf16>,
    return
  }
  func.func @transform_0(%arg0: i32) -> (i32, i32) {
    %c0_i32 = arith.constant 0 : i32
    %c0_i32_0 = arith.constant 0 : i32
    return %arg0, %c0_i32 : i32, i32
  }
  func.func @transform_1(%arg0: i32) -> (i32, i32) {
    %c0_i32 = arith.constant 0 : i32
    %c0_i32_0 = arith.constant 0 : i32
    %c0_i32_1 = arith.constant 0 : i32
    return %c0_i32, %c0_i32_0 : i32, i32
  }
  func.func @transform_2(%arg0: i32) -> (i32, i32) {
    %c0_i32 = arith.constant 0 : i32
    %c0_i32_0 = arith.constant 0 : i32
    %c0_i32_1 = arith.constant 0 : i32
    return %c0_i32, %c0_i32_0 : i32, i32
  }
  func.func @transform_3(%arg0: i32) -> (i32, i32) {
    %c0_i32 = arith.constant 0 : i32
    %c0_i32_0 = arith.constant 0 : i32
    return %arg0, %c0_i32 : i32, i32
  }
  func.func @transform_4(%arg0: i32) -> (i32, i32) {
    %c0_i32 = arith.constant 0 : i32
    %c0_i32_0 = arith.constant 0 : i32
    return %arg0, %c0_i32 : i32, i32
  }
}

module attributes {stable_mosaic.version = 11 : i64} {
  func.func @_proj_pair_kernel(%arg0: i32, %arg1: memref<16x32xf32, #tpu.memory_space<vmem>>, %arg2: memref<16x32xf32, #tpu.memory_space<vmem>>, %arg3: memref<64x256xbf16, #tpu.memory_space<vmem>>, %arg4: memref<1x256xf32, #tpu.memory_space<vmem>>, %arg5: memref<16x128xbf16, #tpu.memory_space<vmem>>, %arg6: memref<16x128xbf16, #tpu.memory_space<vmem>>) attributes {dimension_semantics = [#tpu.dimension_semantics<parallel>], iteration_bounds = array<i64: 1>, scalar_prefetch = 0 : i64, scratch_operands = 0 : i64, tpu.core_type = #tpu.core_type<tc>, window_params = [{transform_indices = @transform_0, window_bounds = array<i64: 16, 32>}, {transform_indices = @transform_1, window_bounds = array<i64: 16, 32>}, {pipeline_mode = #tpu.pipeline_mode<synchronous>, transform_indices = @transform_2, window_bounds = array<i64: 64, 256>}, {pipeline_mode = #tpu.pipeline_mode<synchronous>, transform_indices = @transform_3, window_bounds = array<i64: 1, 256>}, {transform_indices = @transform_4, window_bounds = array<i64: 16, 128>}, {transform_indices = @transform_5, window_bounds = array<i64: 16, 128>}]} {
    %c0 = arith.constant 0 : index
    %c0_0 = arith.constant 0 : index
    %0 = vector.load %arg1[%c0, %c0_0] : memref<16x32xf32, #tpu.memory_space<vmem>>, vector<16x32xf32>
    %c0_1 = arith.constant 0 : index
    %c0_2 = arith.constant 0 : index
    %1 = vector.load %arg2[%c0_1, %c0_2] : memref<16x32xf32, #tpu.memory_space<vmem>>, vector<16x32xf32>
    %2 = tpu.concatenate %0, %1 in 1 : vector<16x32xf32>, vector<16x32xf32> -> vector<16x64xf32>
    %3 = arith.truncf %2 : vector<16x64xf32> to vector<16x64xbf16>
    %c0_3 = arith.constant 0 : index
    %c0_4 = arith.constant 0 : index
    %4 = vector.load %arg3[%c0_3, %c0_4] : memref<64x256xbf16, #tpu.memory_space<vmem>>, vector<64x256xbf16>
    %cst = arith.constant dense<0.000000e+00> : vector<16x256xf32>
    %5 = tpu.matmul %3, %4, %cst {dimension_numbers = #tpu.dot_dimension_numbers<[1], [0], [0], [1], [0, 0, 1, 1], [], []>} : vector<16x64xbf16>, vector<64x256xbf16>, vector<16x256xf32> -> vector<16x256xf32>
    %c0_5 = arith.constant 0 : index
    %c0_6 = arith.constant 0 : index
    %6 = vector.load %arg4[%c0_5, %c0_6] : memref<1x256xf32, #tpu.memory_space<vmem>>, vector<1x256xf32>
    %7 = vector.broadcast %6 : vector<1x256xf32> to vector<16x256xf32>
    %8 = arith.addf %5, %7 : vector<16x256xf32>
    %9 = vector.extract_strided_slice %8 {offsets = [0, 0], sizes = [16, 128], strides = [1, 1]} : vector<16x256xf32> to vector<16x128xf32>
    %10 = arith.truncf %9 : vector<16x128xf32> to vector<16x128xbf16>
    %c0_7 = arith.constant 0 : index
    %c0_8 = arith.constant 0 : index
    %11 = vector.load %arg5[%c0_7, %c0_8] : memref<16x128xbf16, #tpu.memory_space<vmem>>, vector<16x128xbf16>
    tpu.vector_store %arg5[%c0_7, %c0_8], %10 {strides = array<i32>} : memref<16x128xbf16, #tpu.memory_space<vmem>>, vector<16x128xbf16>,
    %12 = vector.extract_strided_slice %8 {offsets = [0, 128], sizes = [16, 128], strides = [1, 1]} : vector<16x256xf32> to vector<16x128xf32>
    %13 = arith.truncf %12 : vector<16x128xf32> to vector<16x128xbf16>
    %c0_9 = arith.constant 0 : index
    %c0_10 = arith.constant 0 : index
    %14 = vector.load %arg6[%c0_9, %c0_10] : memref<16x128xbf16, #tpu.memory_space<vmem>>, vector<16x128xbf16>
    tpu.vector_store %arg6[%c0_9, %c0_10], %13 {strides = array<i32>} : memref<16x128xbf16, #tpu.memory_space<vmem>>, vector<16x128xbf16>,
    return
  }
  func.func @transform_0(%arg0: i32) -> (i32, i32) {
    %c0_i32 = arith.constant 0 : i32
    %c0_i32_0 = arith.constant 0 : i32
    return %arg0, %c0_i32 : i32, i32
  }
  func.func @transform_1(%arg0: i32) -> (i32, i32) {
    %c0_i32 = arith.constant 0 : i32
    %c0_i32_0 = arith.constant 0 : i32
    return %arg0, %c0_i32 : i32, i32
  }
  func.func @transform_2(%arg0: i32) -> (i32, i32) {
    %c0_i32 = arith.constant 0 : i32
    %c0_i32_0 = arith.constant 0 : i32
    %c0_i32_1 = arith.constant 0 : i32
    return %c0_i32, %c0_i32_0 : i32, i32
  }
  func.func @transform_3(%arg0: i32) -> (i32, i32) {
    %c0_i32 = arith.constant 0 : i32
    %c0_i32_0 = arith.constant 0 : i32
    %c0_i32_1 = arith.constant 0 : i32
    return %c0_i32, %c0_i32_0 : i32, i32
  }
  func.func @transform_4(%arg0: i32) -> (i32, i32) {
    %c0_i32 = arith.constant 0 : i32
    %c0_i32_0 = arith.constant 0 : i32
    return %arg0, %c0_i32 : i32, i32
  }
  func.func @transform_5(%arg0: i32) -> (i32, i32) {
    %c0_i32 = arith.constant 0 : i32
    %c0_i32_0 = arith.constant 0 : i32
    return %arg0, %c0_i32 : i32, i32
  }
}

module attributes {stable_mosaic.version = 11 : i64} {
  func.func @_bilstm_scan_kernel(%arg0: i32, %arg1: memref<8x2x128xbf16, #tpu.memory_space<vmem>>, %arg2: memref<8x2x128xbf16, #tpu.memory_space<vmem>>, %arg3: memref<64x256xbf16, #tpu.memory_space<vmem>>, %arg4: memref<8x2x32xf32, #tpu.memory_space<vmem>>, %arg5: memref<8x2x32xf32, #tpu.memory_space<vmem>>, %arg6: memref<2x64xf32, #tpu.memory_space<vmem>>, %arg7: memref<2x64xf32, #tpu.memory_space<vmem>>) attributes {dimension_semantics = [#tpu.dimension_semantics<arbitrary>], iteration_bounds = array<i64: 1>, scalar_prefetch = 0 : i64, scratch_operands = 2 : i64, tpu.core_type = #tpu.core_type<tc>, window_params = [{transform_indices = @transform_0, window_bounds = array<i64: 8, 2, 128>}, {transform_indices = @transform_1, window_bounds = array<i64: 8, 2, 128>}, {pipeline_mode = #tpu.pipeline_mode<synchronous>, transform_indices = @transform_2, window_bounds = array<i64: 64, 256>}, {transform_indices = @transform_3, window_bounds = array<i64: 8, 2, 32>}, {transform_indices = @transform_4, window_bounds = array<i64: 8, 2, 32>}]} {
    %c0_i32 = arith.constant 0 : i32
    %0 = arith.cmpi eq, %arg0, %c0_i32 : i32
    %1 = arith.extui %0 : i1 to i32
    %c0_i32_0 = arith.constant 0 : i32
    %2 = arith.cmpi ne, %1, %c0_i32_0 : i32
    scf.if %2 {
      %cst_162 = arith.constant 0.000000e+00 : f32
      %508 = vector.broadcast %cst_162 : f32 to vector<2x64xf32>
      %c0_163 = arith.constant 0 : index
      %c0_164 = arith.constant 0 : index
      %509 = vector.load %arg6[%c0_163, %c0_164] : memref<2x64xf32, #tpu.memory_space<vmem>>, vector<2x64xf32>
      tpu.vector_store %arg6[%c0_163, %c0_164], %508 {strides = array<i32>} : memref<2x64xf32, #tpu.memory_space<vmem>>, vector<2x64xf32>,
      %cst_165 = arith.constant 0.000000e+00 : f32
      %510 = vector.broadcast %cst_165 : f32 to vector<2x64xf32>
      %c0_166 = arith.constant 0 : index
      %c0_167 = arith.constant 0 : index
      %511 = vector.load %arg7[%c0_166, %c0_167] : memref<2x64xf32, #tpu.memory_space<vmem>>, vector<2x64xf32>
      tpu.vector_store %arg7[%c0_166, %c0_167], %510 {strides = array<i32>} : memref<2x64xf32, #tpu.memory_space<vmem>>, vector<2x64xf32>,
    } else {
    }
    %c0 = arith.constant 0 : index
    %c0_1 = arith.constant 0 : index
    %3 = vector.load %arg3[%c0, %c0_1] : memref<64x256xbf16, #tpu.memory_space<vmem>>, vector<64x256xbf16>
    %c0_i32_2 = arith.constant 0 : i32
    %c0_3 = arith.constant 0 : index
    %c0_4 = arith.constant 0 : index
    %4 = vector.load %arg6[%c0_3, %c0_4] : memref<2x64xf32, #tpu.memory_space<vmem>>, vector<2x64xf32>
    %c0_5 = arith.constant 0 : index
    %c0_6 = arith.constant 0 : index
    %5 = vector.load %arg7[%c0_5, %c0_6] : memref<2x64xf32, #tpu.memory_space<vmem>>, vector<2x64xf32>
    %6 = arith.truncf %4 : vector<2x64xf32> to vector<2x64xbf16>
    %cst = arith.constant dense<0.000000e+00> : vector<2x256xf32>
    %7 = tpu.matmul %6, %3, %cst {dimension_numbers = #tpu.dot_dimension_numbers<[1], [0], [0], [1], [0, 0, 1, 1], [], []>} : vector<2x64xbf16>, vector<64x256xbf16>, vector<2x256xf32> -> vector<2x256xf32>
    %c7_i32 = arith.constant 7 : i32
    %8 = arith.subi %c7_i32, %c0_i32_2 : i32
    %9 = arith.index_cast %c0_i32_2 : i32 to index
    %c0_7 = arith.constant 0 : index
    %c0_8 = arith.constant 0 : index
    %10 = vector.load %arg1[%9, %c0_7, %c0_8] : memref<8x2x128xbf16, #tpu.memory_space<vmem>>, vector<1x2x128xbf16>
    %11 = vector.shape_cast %10 : vector<1x2x128xbf16> to vector<2x128xbf16>
    %12 = arith.extf %11 : vector<2x128xbf16> to vector<2x128xf32>
    %13 = vector.extract_strided_slice %7 {offsets = [0, 0], sizes = [2, 128], strides = [1, 1]} : vector<2x256xf32> to vector<2x128xf32>
    %14 = arith.addf %12, %13 : vector<2x128xf32>
    %15 = arith.index_cast %8 : i32 to index
    %c0_9 = arith.constant 0 : index
    %c0_10 = arith.constant 0 : index
    %16 = vector.load %arg2[%15, %c0_9, %c0_10] : memref<8x2x128xbf16, #tpu.memory_space<vmem>>, vector<1x2x128xbf16>
    %17 = vector.shape_cast %16 : vector<1x2x128xbf16> to vector<2x128xbf16>
    %18 = arith.extf %17 : vector<2x128xbf16> to vector<2x128xf32>
    %19 = vector.extract_strided_slice %7 {offsets = [0, 128], sizes = [2, 128], strides = [1, 1]} : vector<2x256xf32> to vector<2x128xf32>
    %20 = arith.addf %18, %19 : vector<2x128xf32>
    %21 = vector.extract_strided_slice %14 {offsets = [0, 0], sizes = [2, 96], strides = [1, 1]} : vector<2x128xf32> to vector<2x96xf32>
    %22 = arith.negf %21 : vector<2x96xf32>
    %23 = math.exp %22 : vector<2x96xf32>
    %cst_11 = arith.constant 1.000000e+00 : f32
    %24 = vector.broadcast %cst_11 : f32 to vector<2x96xf32>
    %25 = arith.addf %24, %23 : vector<2x96xf32>
    %26 = arith.divf %24, %25 : vector<2x96xf32>
    %27 = vector.extract_strided_slice %14 {offsets = [0, 96], sizes = [2, 32], strides = [1, 1]} : vector<2x128xf32> to vector<2x32xf32>
    %28 = math.tanh %27 : vector<2x32xf32>
    %29 = vector.extract_strided_slice %20 {offsets = [0, 0], sizes = [2, 96], strides = [1, 1]} : vector<2x128xf32> to vector<2x96xf32>
    %30 = arith.negf %29 : vector<2x96xf32>
    %31 = math.exp %30 : vector<2x96xf32>
    %cst_12 = arith.constant 1.000000e+00 : f32
    %32 = vector.broadcast %cst_12 : f32 to vector<2x96xf32>
    %33 = arith.addf %32, %31 : vector<2x96xf32>
    %34 = arith.divf %32, %33 : vector<2x96xf32>
    %35 = vector.extract_strided_slice %20 {offsets = [0, 96], sizes = [2, 32], strides = [1, 1]} : vector<2x128xf32> to vector<2x32xf32>
    %36 = math.tanh %35 : vector<2x32xf32>
    %37 = vector.extract_strided_slice %26 {offsets = [0, 32], sizes = [2, 32], strides = [1, 1]} : vector<2x96xf32> to vector<2x32xf32>
    %38 = vector.extract_strided_slice %5 {offsets = [0, 0], sizes = [2, 32], strides = [1, 1]} : vector<2x64xf32> to vector<2x32xf32>
    %39 = arith.mulf %37, %38 : vector<2x32xf32>
    %40 = vector.extract_strided_slice %26 {offsets = [0, 0], sizes = [2, 32], strides = [1, 1]} : vector<2x96xf32> to vector<2x32xf32>
    %41 = arith.mulf %40, %28 : vector<2x32xf32>
    %42 = arith.addf %39, %41 : vector<2x32xf32>
    %43 = vector.extract_strided_slice %34 {offsets = [0, 32], sizes = [2, 32], strides = [1, 1]} : vector<2x96xf32> to vector<2x32xf32>
    %44 = vector.extract_strided_slice %5 {offsets = [0, 32], sizes = [2, 32], strides = [1, 1]} : vector<2x64xf32> to vector<2x32xf32>
    %45 = arith.mulf %43, %44 : vector<2x32xf32>
    %46 = vector.extract_strided_slice %34 {offsets = [0, 0], sizes = [2, 32], strides = [1, 1]} : vector<2x96xf32> to vector<2x32xf32>
    %47 = arith.mulf %46, %36 : vector<2x32xf32>
    %48 = arith.addf %45, %47 : vector<2x32xf32>
    %49 = tpu.concatenate %42, %48 in 1 : vector<2x32xf32>, vector<2x32xf32> -> vector<2x64xf32>
    %50 = vector.extract_strided_slice %26 {offsets = [0, 64], sizes = [2, 32], strides = [1, 1]} : vector<2x96xf32> to vector<2x32xf32>
    %51 = vector.extract_strided_slice %34 {offsets = [0, 64], sizes = [2, 32], strides = [1, 1]} : vector<2x96xf32> to vector<2x32xf32>
    %52 = tpu.concatenate %50, %51 in 1 : vector<2x32xf32>, vector<2x32xf32> -> vector<2x64xf32>
    %53 = math.tanh %49 : vector<2x64xf32>
    %54 = arith.mulf %52, %53 : vector<2x64xf32>
    %c0_13 = arith.constant 0 : index
    %c0_14 = arith.constant 0 : index
    %55 = vector.load %arg7[%c0_13, %c0_14] : memref<2x64xf32, #tpu.memory_space<vmem>>, vector<2x64xf32>
    tpu.vector_store %arg7[%c0_13, %c0_14], %49 {strides = array<i32>} : memref<2x64xf32, #tpu.memory_space<vmem>>, vector<2x64xf32>,
    %c0_15 = arith.constant 0 : index
    %c0_16 = arith.constant 0 : index
    %56 = vector.load %arg6[%c0_15, %c0_16] : memref<2x64xf32, #tpu.memory_space<vmem>>, vector<2x64xf32>
    tpu.vector_store %arg6[%c0_15, %c0_16], %54 {strides = array<i32>} : memref<2x64xf32, #tpu.memory_space<vmem>>, vector<2x64xf32>,
    %57 = vector.extract_strided_slice %54 {offsets = [0, 0], sizes = [2, 32], strides = [1, 1]} : vector<2x64xf32> to vector<2x32xf32>
    %58 = arith.index_cast %c0_i32_2 : i32 to index
    %c0_17 = arith.constant 0 : index
    %c0_18 = arith.constant 0 : index
    %59 = vector.load %arg4[%58, %c0_17, %c0_18] : memref<8x2x32xf32, #tpu.memory_space<vmem>>, vector<1x2x32xf32>
    %60 = vector.shape_cast %59 : vector<1x2x32xf32> to vector<2x32xf32>
    %61 = vector.shape_cast %57 : vector<2x32xf32> to vector<1x2x32xf32>
    tpu.vector_store %arg4[%58, %c0_17, %c0_18], %61 {strides = array<i32>} : memref<8x2x32xf32, #tpu.memory_space<vmem>>, vector<1x2x32xf32>,
    %62 = vector.extract_strided_slice %54 {offsets = [0, 32], sizes = [2, 32], strides = [1, 1]} : vector<2x64xf32> to vector<2x32xf32>
    %63 = arith.index_cast %8 : i32 to index
    %c0_19 = arith.constant 0 : index
    %c0_20 = arith.constant 0 : index
    %64 = vector.load %arg5[%63, %c0_19, %c0_20] : memref<8x2x32xf32, #tpu.memory_space<vmem>>, vector<1x2x32xf32>
    %65 = vector.shape_cast %64 : vector<1x2x32xf32> to vector<2x32xf32>
    %66 = vector.shape_cast %62 : vector<2x32xf32> to vector<1x2x32xf32>
    tpu.vector_store %arg5[%63, %c0_19, %c0_20], %66 {strides = array<i32>} : memref<8x2x32xf32, #tpu.memory_space<vmem>>, vector<1x2x32xf32>,
    %c1_i32 = arith.constant 1 : i32
    %c0_21 = arith.constant 0 : index
    %c0_22 = arith.constant 0 : index
    %67 = vector.load %arg6[%c0_21, %c0_22] : memref<2x64xf32, #tpu.memory_space<vmem>>, vector<2x64xf32>
    %c0_23 = arith.constant 0 : index
    %c0_24 = arith.constant 0 : index
    %68 = vector.load %arg7[%c0_23, %c0_24] : memref<2x64xf32, #tpu.memory_space<vmem>>, vector<2x64xf32>
    %69 = arith.truncf %67 : vector<2x64xf32> to vector<2x64xbf16>
    %cst_25 = arith.constant dense<0.000000e+00> : vector<2x256xf32>
    %70 = tpu.matmul %69, %3, %cst_25 {dimension_numbers = #tpu.dot_dimension_numbers<[1], [0], [0], [1], [0, 0, 1, 1], [], []>} : vector<2x64xbf16>, vector<64x256xbf16>, vector<2x256xf32> -> vector<2x256xf32>
    %c7_i32_26 = arith.constant 7 : i32
    %71 = arith.subi %c7_i32_26, %c1_i32 : i32
    %72 = arith.index_cast %c1_i32 : i32 to index
    %c0_27 = arith.constant 0 : index
    %c0_28 = arith.constant 0 : index
    %73 = vector.load %arg1[%72, %c0_27, %c0_28] : memref<8x2x128xbf16, #tpu.memory_space<vmem>>, vector<1x2x128xbf16>
    %74 = vector.shape_cast %73 : vector<1x2x128xbf16> to vector<2x128xbf16>
    %75 = arith.extf %74 : vector<2x128xbf16> to vector<2x128xf32>
    %76 = vector.extract_strided_slice %70 {offsets = [0, 0], sizes = [2, 128], strides = [1, 1]} : vector<2x256xf32> to vector<2x128xf32>
    %77 = arith.addf %75, %76 : vector<2x128xf32>
    %78 = arith.index_cast %71 : i32 to index
    %c0_29 = arith.constant 0 : index
    %c0_30 = arith.constant 0 : index
    %79 = vector.load %arg2[%78, %c0_29, %c0_30] : memref<8x2x128xbf16, #tpu.memory_space<vmem>>, vector<1x2x128xbf16>
    %80 = vector.shape_cast %79 : vector<1x2x128xbf16> to vector<2x128xbf16>
    %81 = arith.extf %80 : vector<2x128xbf16> to vector<2x128xf32>
    %82 = vector.extract_strided_slice %70 {offsets = [0, 128], sizes = [2, 128], strides = [1, 1]} : vector<2x256xf32> to vector<2x128xf32>
    %83 = arith.addf %81, %82 : vector<2x128xf32>
    %84 = vector.extract_strided_slice %77 {offsets = [0, 0], sizes = [2, 96], strides = [1, 1]} : vector<2x128xf32> to vector<2x96xf32>
    %85 = arith.negf %84 : vector<2x96xf32>
    %86 = math.exp %85 : vector<2x96xf32>
    %cst_31 = arith.constant 1.000000e+00 : f32
    %87 = vector.broadcast %cst_31 : f32 to vector<2x96xf32>
    %88 = arith.addf %87, %86 : vector<2x96xf32>
    %89 = arith.divf %87, %88 : vector<2x96xf32>
    %90 = vector.extract_strided_slice %77 {offsets = [0, 96], sizes = [2, 32], strides = [1, 1]} : vector<2x128xf32> to vector<2x32xf32>
    %91 = math.tanh %90 : vector<2x32xf32>
    %92 = vector.extract_strided_slice %83 {offsets = [0, 0], sizes = [2, 96], strides = [1, 1]} : vector<2x128xf32> to vector<2x96xf32>
    %93 = arith.negf %92 : vector<2x96xf32>
    %94 = math.exp %93 : vector<2x96xf32>
    %cst_32 = arith.constant 1.000000e+00 : f32
    %95 = vector.broadcast %cst_32 : f32 to vector<2x96xf32>
    %96 = arith.addf %95, %94 : vector<2x96xf32>
    %97 = arith.divf %95, %96 : vector<2x96xf32>
    %98 = vector.extract_strided_slice %83 {offsets = [0, 96], sizes = [2, 32], strides = [1, 1]} : vector<2x128xf32> to vector<2x32xf32>
    %99 = math.tanh %98 : vector<2x32xf32>
    %100 = vector.extract_strided_slice %89 {offsets = [0, 32], sizes = [2, 32], strides = [1, 1]} : vector<2x96xf32> to vector<2x32xf32>
    %101 = vector.extract_strided_slice %68 {offsets = [0, 0], sizes = [2, 32], strides = [1, 1]} : vector<2x64xf32> to vector<2x32xf32>
    %102 = arith.mulf %100, %101 : vector<2x32xf32>
    %103 = vector.extract_strided_slice %89 {offsets = [0, 0], sizes = [2, 32], strides = [1, 1]} : vector<2x96xf32> to vector<2x32xf32>
    %104 = arith.mulf %103, %91 : vector<2x32xf32>
    %105 = arith.addf %102, %104 : vector<2x32xf32>
    %106 = vector.extract_strided_slice %97 {offsets = [0, 32], sizes = [2, 32], strides = [1, 1]} : vector<2x96xf32> to vector<2x32xf32>
    %107 = vector.extract_strided_slice %68 {offsets = [0, 32], sizes = [2, 32], strides = [1, 1]} : vector<2x64xf32> to vector<2x32xf32>
    %108 = arith.mulf %106, %107 : vector<2x32xf32>
    %109 = vector.extract_strided_slice %97 {offsets = [0, 0], sizes = [2, 32], strides = [1, 1]} : vector<2x96xf32> to vector<2x32xf32>
    %110 = arith.mulf %109, %99 : vector<2x32xf32>
    %111 = arith.addf %108, %110 : vector<2x32xf32>
    %112 = tpu.concatenate %105, %111 in 1 : vector<2x32xf32>, vector<2x32xf32> -> vector<2x64xf32>
    %113 = vector.extract_strided_slice %89 {offsets = [0, 64], sizes = [2, 32], strides = [1, 1]} : vector<2x96xf32> to vector<2x32xf32>
    %114 = vector.extract_strided_slice %97 {offsets = [0, 64], sizes = [2, 32], strides = [1, 1]} : vector<2x96xf32> to vector<2x32xf32>
    %115 = tpu.concatenate %113, %114 in 1 : vector<2x32xf32>, vector<2x32xf32> -> vector<2x64xf32>
    %116 = math.tanh %112 : vector<2x64xf32>
    %117 = arith.mulf %115, %116 : vector<2x64xf32>
    %c0_33 = arith.constant 0 : index
    %c0_34 = arith.constant 0 : index
    %118 = vector.load %arg7[%c0_33, %c0_34] : memref<2x64xf32, #tpu.memory_space<vmem>>, vector<2x64xf32>
    tpu.vector_store %arg7[%c0_33, %c0_34], %112 {strides = array<i32>} : memref<2x64xf32, #tpu.memory_space<vmem>>, vector<2x64xf32>,
    %c0_35 = arith.constant 0 : index
    %c0_36 = arith.constant 0 : index
    %119 = vector.load %arg6[%c0_35, %c0_36] : memref<2x64xf32, #tpu.memory_space<vmem>>, vector<2x64xf32>
    tpu.vector_store %arg6[%c0_35, %c0_36], %117 {strides = array<i32>} : memref<2x64xf32, #tpu.memory_space<vmem>>, vector<2x64xf32>,
    %120 = vector.extract_strided_slice %117 {offsets = [0, 0], sizes = [2, 32], strides = [1, 1]} : vector<2x64xf32> to vector<2x32xf32>
    %121 = arith.index_cast %c1_i32 : i32 to index
    %c0_37 = arith.constant 0 : index
    %c0_38 = arith.constant 0 : index
    %122 = vector.load %arg4[%121, %c0_37, %c0_38] : memref<8x2x32xf32, #tpu.memory_space<vmem>>, vector<1x2x32xf32>
    %123 = vector.shape_cast %122 : vector<1x2x32xf32> to vector<2x32xf32>
    %124 = vector.shape_cast %120 : vector<2x32xf32> to vector<1x2x32xf32>
    tpu.vector_store %arg4[%121, %c0_37, %c0_38], %124 {strides = array<i32>} : memref<8x2x32xf32, #tpu.memory_space<vmem>>, vector<1x2x32xf32>,
    %125 = vector.extract_strided_slice %117 {offsets = [0, 32], sizes = [2, 32], strides = [1, 1]} : vector<2x64xf32> to vector<2x32xf32>
    %126 = arith.index_cast %71 : i32 to index
    %c0_39 = arith.constant 0 : index
    %c0_40 = arith.constant 0 : index
    %127 = vector.load %arg5[%126, %c0_39, %c0_40] : memref<8x2x32xf32, #tpu.memory_space<vmem>>, vector<1x2x32xf32>
    %128 = vector.shape_cast %127 : vector<1x2x32xf32> to vector<2x32xf32>
    %129 = vector.shape_cast %125 : vector<2x32xf32> to vector<1x2x32xf32>
    tpu.vector_store %arg5[%126, %c0_39, %c0_40], %129 {strides = array<i32>} : memref<8x2x32xf32, #tpu.memory_space<vmem>>, vector<1x2x32xf32>,
    %c2_i32 = arith.constant 2 : i32
    %c0_41 = arith.constant 0 : index
    %c0_42 = arith.constant 0 : index
    %130 = vector.load %arg6[%c0_41, %c0_42] : memref<2x64xf32, #tpu.memory_space<vmem>>, vector<2x64xf32>
    %c0_43 = arith.constant 0 : index
    %c0_44 = arith.constant 0 : index
    %131 = vector.load %arg7[%c0_43, %c0_44] : memref<2x64xf32, #tpu.memory_space<vmem>>, vector<2x64xf32>
    %132 = arith.truncf %130 : vector<2x64xf32> to vector<2x64xbf16>
    %cst_45 = arith.constant dense<0.000000e+00> : vector<2x256xf32>
    %133 = tpu.matmul %132, %3, %cst_45 {dimension_numbers = #tpu.dot_dimension_numbers<[1], [0], [0], [1], [0, 0, 1, 1], [], []>} : vector<2x64xbf16>, vector<64x256xbf16>, vector<2x256xf32> -> vector<2x256xf32>
    %c7_i32_46 = arith.constant 7 : i32
    %134 = arith.subi %c7_i32_46, %c2_i32 : i32
    %135 = arith.index_cast %c2_i32 : i32 to index
    %c0_47 = arith.constant 0 : index
    %c0_48 = arith.constant 0 : index
    %136 = vector.load %arg1[%135, %c0_47, %c0_48] : memref<8x2x128xbf16, #tpu.memory_space<vmem>>, vector<1x2x128xbf16>
    %137 = vector.shape_cast %136 : vector<1x2x128xbf16> to vector<2x128xbf16>
    %138 = arith.extf %137 : vector<2x128xbf16> to vector<2x128xf32>
    %139 = vector.extract_strided_slice %133 {offsets = [0, 0], sizes = [2, 128], strides = [1, 1]} : vector<2x256xf32> to vector<2x128xf32>
    %140 = arith.addf %138, %139 : vector<2x128xf32>
    %141 = arith.index_cast %134 : i32 to index
    %c0_49 = arith.constant 0 : index
    %c0_50 = arith.constant 0 : index
    %142 = vector.load %arg2[%141, %c0_49, %c0_50] : memref<8x2x128xbf16, #tpu.memory_space<vmem>>, vector<1x2x128xbf16>
    %143 = vector.shape_cast %142 : vector<1x2x128xbf16> to vector<2x128xbf16>
    %144 = arith.extf %143 : vector<2x128xbf16> to vector<2x128xf32>
    %145 = vector.extract_strided_slice %133 {offsets = [0, 128], sizes = [2, 128], strides = [1, 1]} : vector<2x256xf32> to vector<2x128xf32>
    %146 = arith.addf %144, %145 : vector<2x128xf32>
    %147 = vector.extract_strided_slice %140 {offsets = [0, 0], sizes = [2, 96], strides = [1, 1]} : vector<2x128xf32> to vector<2x96xf32>
    %148 = arith.negf %147 : vector<2x96xf32>
    %149 = math.exp %148 : vector<2x96xf32>
    %cst_51 = arith.constant 1.000000e+00 : f32
    %150 = vector.broadcast %cst_51 : f32 to vector<2x96xf32>
    %151 = arith.addf %150, %149 : vector<2x96xf32>
    %152 = arith.divf %150, %151 : vector<2x96xf32>
    %153 = vector.extract_strided_slice %140 {offsets = [0, 96], sizes = [2, 32], strides = [1, 1]} : vector<2x128xf32> to vector<2x32xf32>
    %154 = math.tanh %153 : vector<2x32xf32>
    %155 = vector.extract_strided_slice %146 {offsets = [0, 0], sizes = [2, 96], strides = [1, 1]} : vector<2x128xf32> to vector<2x96xf32>
    %156 = arith.negf %155 : vector<2x96xf32>
    %157 = math.exp %156 : vector<2x96xf32>
    %cst_52 = arith.constant 1.000000e+00 : f32
    %158 = vector.broadcast %cst_52 : f32 to vector<2x96xf32>
    %159 = arith.addf %158, %157 : vector<2x96xf32>
    %160 = arith.divf %158, %159 : vector<2x96xf32>
    %161 = vector.extract_strided_slice %146 {offsets = [0, 96], sizes = [2, 32], strides = [1, 1]} : vector<2x128xf32> to vector<2x32xf32>
    %162 = math.tanh %161 : vector<2x32xf32>
    %163 = vector.extract_strided_slice %152 {offsets = [0, 32], sizes = [2, 32], strides = [1, 1]} : vector<2x96xf32> to vector<2x32xf32>
    %164 = vector.extract_strided_slice %131 {offsets = [0, 0], sizes = [2, 32], strides = [1, 1]} : vector<2x64xf32> to vector<2x32xf32>
    %165 = arith.mulf %163, %164 : vector<2x32xf32>
    %166 = vector.extract_strided_slice %152 {offsets = [0, 0], sizes = [2, 32], strides = [1, 1]} : vector<2x96xf32> to vector<2x32xf32>
    %167 = arith.mulf %166, %154 : vector<2x32xf32>
    %168 = arith.addf %165, %167 : vector<2x32xf32>
    %169 = vector.extract_strided_slice %160 {offsets = [0, 32], sizes = [2, 32], strides = [1, 1]} : vector<2x96xf32> to vector<2x32xf32>
    %170 = vector.extract_strided_slice %131 {offsets = [0, 32], sizes = [2, 32], strides = [1, 1]} : vector<2x64xf32> to vector<2x32xf32>
    %171 = arith.mulf %169, %170 : vector<2x32xf32>
    %172 = vector.extract_strided_slice %160 {offsets = [0, 0], sizes = [2, 32], strides = [1, 1]} : vector<2x96xf32> to vector<2x32xf32>
    %173 = arith.mulf %172, %162 : vector<2x32xf32>
    %174 = arith.addf %171, %173 : vector<2x32xf32>
    %175 = tpu.concatenate %168, %174 in 1 : vector<2x32xf32>, vector<2x32xf32> -> vector<2x64xf32>
    %176 = vector.extract_strided_slice %152 {offsets = [0, 64], sizes = [2, 32], strides = [1, 1]} : vector<2x96xf32> to vector<2x32xf32>
    %177 = vector.extract_strided_slice %160 {offsets = [0, 64], sizes = [2, 32], strides = [1, 1]} : vector<2x96xf32> to vector<2x32xf32>
    %178 = tpu.concatenate %176, %177 in 1 : vector<2x32xf32>, vector<2x32xf32> -> vector<2x64xf32>
    %179 = math.tanh %175 : vector<2x64xf32>
    %180 = arith.mulf %178, %179 : vector<2x64xf32>
    %c0_53 = arith.constant 0 : index
    %c0_54 = arith.constant 0 : index
    %181 = vector.load %arg7[%c0_53, %c0_54] : memref<2x64xf32, #tpu.memory_space<vmem>>, vector<2x64xf32>
    tpu.vector_store %arg7[%c0_53, %c0_54], %175 {strides = array<i32>} : memref<2x64xf32, #tpu.memory_space<vmem>>, vector<2x64xf32>,
    %c0_55 = arith.constant 0 : index
    %c0_56 = arith.constant 0 : index
    %182 = vector.load %arg6[%c0_55, %c0_56] : memref<2x64xf32, #tpu.memory_space<vmem>>, vector<2x64xf32>
    tpu.vector_store %arg6[%c0_55, %c0_56], %180 {strides = array<i32>} : memref<2x64xf32, #tpu.memory_space<vmem>>, vector<2x64xf32>,
    %183 = vector.extract_strided_slice %180 {offsets = [0, 0], sizes = [2, 32], strides = [1, 1]} : vector<2x64xf32> to vector<2x32xf32>
    %184 = arith.index_cast %c2_i32 : i32 to index
    %c0_57 = arith.constant 0 : index
    %c0_58 = arith.constant 0 : index
    %185 = vector.load %arg4[%184, %c0_57, %c0_58] : memref<8x2x32xf32, #tpu.memory_space<vmem>>, vector<1x2x32xf32>
    %186 = vector.shape_cast %185 : vector<1x2x32xf32> to vector<2x32xf32>
    %187 = vector.shape_cast %183 : vector<2x32xf32> to vector<1x2x32xf32>
    tpu.vector_store %arg4[%184, %c0_57, %c0_58], %187 {strides = array<i32>} : memref<8x2x32xf32, #tpu.memory_space<vmem>>, vector<1x2x32xf32>,
    %188 = vector.extract_strided_slice %180 {offsets = [0, 32], sizes = [2, 32], strides = [1, 1]} : vector<2x64xf32> to vector<2x32xf32>
    %189 = arith.index_cast %134 : i32 to index
    %c0_59 = arith.constant 0 : index
    %c0_60 = arith.constant 0 : index
    %190 = vector.load %arg5[%189, %c0_59, %c0_60] : memref<8x2x32xf32, #tpu.memory_space<vmem>>, vector<1x2x32xf32>
    %191 = vector.shape_cast %190 : vector<1x2x32xf32> to vector<2x32xf32>
    %192 = vector.shape_cast %188 : vector<2x32xf32> to vector<1x2x32xf32>
    tpu.vector_store %arg5[%189, %c0_59, %c0_60], %192 {strides = array<i32>} : memref<8x2x32xf32, #tpu.memory_space<vmem>>, vector<1x2x32xf32>,
    %c3_i32 = arith.constant 3 : i32
    %c0_61 = arith.constant 0 : index
    %c0_62 = arith.constant 0 : index
    %193 = vector.load %arg6[%c0_61, %c0_62] : memref<2x64xf32, #tpu.memory_space<vmem>>, vector<2x64xf32>
    %c0_63 = arith.constant 0 : index
    %c0_64 = arith.constant 0 : index
    %194 = vector.load %arg7[%c0_63, %c0_64] : memref<2x64xf32, #tpu.memory_space<vmem>>, vector<2x64xf32>
    %195 = arith.truncf %193 : vector<2x64xf32> to vector<2x64xbf16>
    %cst_65 = arith.constant dense<0.000000e+00> : vector<2x256xf32>
    %196 = tpu.matmul %195, %3, %cst_65 {dimension_numbers = #tpu.dot_dimension_numbers<[1], [0], [0], [1], [0, 0, 1, 1], [], []>} : vector<2x64xbf16>, vector<64x256xbf16>, vector<2x256xf32> -> vector<2x256xf32>
    %c7_i32_66 = arith.constant 7 : i32
    %197 = arith.subi %c7_i32_66, %c3_i32 : i32
    %198 = arith.index_cast %c3_i32 : i32 to index
    %c0_67 = arith.constant 0 : index
    %c0_68 = arith.constant 0 : index
    %199 = vector.load %arg1[%198, %c0_67, %c0_68] : memref<8x2x128xbf16, #tpu.memory_space<vmem>>, vector<1x2x128xbf16>
    %200 = vector.shape_cast %199 : vector<1x2x128xbf16> to vector<2x128xbf16>
    %201 = arith.extf %200 : vector<2x128xbf16> to vector<2x128xf32>
    %202 = vector.extract_strided_slice %196 {offsets = [0, 0], sizes = [2, 128], strides = [1, 1]} : vector<2x256xf32> to vector<2x128xf32>
    %203 = arith.addf %201, %202 : vector<2x128xf32>
    %204 = arith.index_cast %197 : i32 to index
    %c0_69 = arith.constant 0 : index
    %c0_70 = arith.constant 0 : index
    %205 = vector.load %arg2[%204, %c0_69, %c0_70] : memref<8x2x128xbf16, #tpu.memory_space<vmem>>, vector<1x2x128xbf16>
    %206 = vector.shape_cast %205 : vector<1x2x128xbf16> to vector<2x128xbf16>
    %207 = arith.extf %206 : vector<2x128xbf16> to vector<2x128xf32>
    %208 = vector.extract_strided_slice %196 {offsets = [0, 128], sizes = [2, 128], strides = [1, 1]} : vector<2x256xf32> to vector<2x128xf32>
    %209 = arith.addf %207, %208 : vector<2x128xf32>
    %210 = vector.extract_strided_slice %203 {offsets = [0, 0], sizes = [2, 96], strides = [1, 1]} : vector<2x128xf32> to vector<2x96xf32>
    %211 = arith.negf %210 : vector<2x96xf32>
    %212 = math.exp %211 : vector<2x96xf32>
    %cst_71 = arith.constant 1.000000e+00 : f32
    %213 = vector.broadcast %cst_71 : f32 to vector<2x96xf32>
    %214 = arith.addf %213, %212 : vector<2x96xf32>
    %215 = arith.divf %213, %214 : vector<2x96xf32>
    %216 = vector.extract_strided_slice %203 {offsets = [0, 96], sizes = [2, 32], strides = [1, 1]} : vector<2x128xf32> to vector<2x32xf32>
    %217 = math.tanh %216 : vector<2x32xf32>
    %218 = vector.extract_strided_slice %209 {offsets = [0, 0], sizes = [2, 96], strides = [1, 1]} : vector<2x128xf32> to vector<2x96xf32>
    %219 = arith.negf %218 : vector<2x96xf32>
    %220 = math.exp %219 : vector<2x96xf32>
    %cst_72 = arith.constant 1.000000e+00 : f32
    %221 = vector.broadcast %cst_72 : f32 to vector<2x96xf32>
    %222 = arith.addf %221, %220 : vector<2x96xf32>
    %223 = arith.divf %221, %222 : vector<2x96xf32>
    %224 = vector.extract_strided_slice %209 {offsets = [0, 96], sizes = [2, 32], strides = [1, 1]} : vector<2x128xf32> to vector<2x32xf32>
    %225 = math.tanh %224 : vector<2x32xf32>
    %226 = vector.extract_strided_slice %215 {offsets = [0, 32], sizes = [2, 32], strides = [1, 1]} : vector<2x96xf32> to vector<2x32xf32>
    %227 = vector.extract_strided_slice %194 {offsets = [0, 0], sizes = [2, 32], strides = [1, 1]} : vector<2x64xf32> to vector<2x32xf32>
    %228 = arith.mulf %226, %227 : vector<2x32xf32>
    %229 = vector.extract_strided_slice %215 {offsets = [0, 0], sizes = [2, 32], strides = [1, 1]} : vector<2x96xf32> to vector<2x32xf32>
    %230 = arith.mulf %229, %217 : vector<2x32xf32>
    %231 = arith.addf %228, %230 : vector<2x32xf32>
    %232 = vector.extract_strided_slice %223 {offsets = [0, 32], sizes = [2, 32], strides = [1, 1]} : vector<2x96xf32> to vector<2x32xf32>
    %233 = vector.extract_strided_slice %194 {offsets = [0, 32], sizes = [2, 32], strides = [1, 1]} : vector<2x64xf32> to vector<2x32xf32>
    %234 = arith.mulf %232, %233 : vector<2x32xf32>
    %235 = vector.extract_strided_slice %223 {offsets = [0, 0], sizes = [2, 32], strides = [1, 1]} : vector<2x96xf32> to vector<2x32xf32>
    %236 = arith.mulf %235, %225 : vector<2x32xf32>
    %237 = arith.addf %234, %236 : vector<2x32xf32>
    %238 = tpu.concatenate %231, %237 in 1 : vector<2x32xf32>, vector<2x32xf32> -> vector<2x64xf32>
    %239 = vector.extract_strided_slice %215 {offsets = [0, 64], sizes = [2, 32], strides = [1, 1]} : vector<2x96xf32> to vector<2x32xf32>
    %240 = vector.extract_strided_slice %223 {offsets = [0, 64], sizes = [2, 32], strides = [1, 1]} : vector<2x96xf32> to vector<2x32xf32>
    %241 = tpu.concatenate %239, %240 in 1 : vector<2x32xf32>, vector<2x32xf32> -> vector<2x64xf32>
    %242 = math.tanh %238 : vector<2x64xf32>
    %243 = arith.mulf %241, %242 : vector<2x64xf32>
    %c0_73 = arith.constant 0 : index
    %c0_74 = arith.constant 0 : index
    %244 = vector.load %arg7[%c0_73, %c0_74] : memref<2x64xf32, #tpu.memory_space<vmem>>, vector<2x64xf32>
    tpu.vector_store %arg7[%c0_73, %c0_74], %238 {strides = array<i32>} : memref<2x64xf32, #tpu.memory_space<vmem>>, vector<2x64xf32>,
    %c0_75 = arith.constant 0 : index
    %c0_76 = arith.constant 0 : index
    %245 = vector.load %arg6[%c0_75, %c0_76] : memref<2x64xf32, #tpu.memory_space<vmem>>, vector<2x64xf32>
    tpu.vector_store %arg6[%c0_75, %c0_76], %243 {strides = array<i32>} : memref<2x64xf32, #tpu.memory_space<vmem>>, vector<2x64xf32>,
    %246 = vector.extract_strided_slice %243 {offsets = [0, 0], sizes = [2, 32], strides = [1, 1]} : vector<2x64xf32> to vector<2x32xf32>
    %247 = arith.index_cast %c3_i32 : i32 to index
    %c0_77 = arith.constant 0 : index
    %c0_78 = arith.constant 0 : index
    %248 = vector.load %arg4[%247, %c0_77, %c0_78] : memref<8x2x32xf32, #tpu.memory_space<vmem>>, vector<1x2x32xf32>
    %249 = vector.shape_cast %248 : vector<1x2x32xf32> to vector<2x32xf32>
    %250 = vector.shape_cast %246 : vector<2x32xf32> to vector<1x2x32xf32>
    tpu.vector_store %arg4[%247, %c0_77, %c0_78], %250 {strides = array<i32>} : memref<8x2x32xf32, #tpu.memory_space<vmem>>, vector<1x2x32xf32>,
    %251 = vector.extract_strided_slice %243 {offsets = [0, 32], sizes = [2, 32], strides = [1, 1]} : vector<2x64xf32> to vector<2x32xf32>
    %252 = arith.index_cast %197 : i32 to index
    %c0_79 = arith.constant 0 : index
    %c0_80 = arith.constant 0 : index
    %253 = vector.load %arg5[%252, %c0_79, %c0_80] : memref<8x2x32xf32, #tpu.memory_space<vmem>>, vector<1x2x32xf32>
    %254 = vector.shape_cast %253 : vector<1x2x32xf32> to vector<2x32xf32>
    %255 = vector.shape_cast %251 : vector<2x32xf32> to vector<1x2x32xf32>
    tpu.vector_store %arg5[%252, %c0_79, %c0_80], %255 {strides = array<i32>} : memref<8x2x32xf32, #tpu.memory_space<vmem>>, vector<1x2x32xf32>,
    %c4_i32 = arith.constant 4 : i32
    %c0_81 = arith.constant 0 : index
    %c0_82 = arith.constant 0 : index
    %256 = vector.load %arg6[%c0_81, %c0_82] : memref<2x64xf32, #tpu.memory_space<vmem>>, vector<2x64xf32>
    %c0_83 = arith.constant 0 : index
    %c0_84 = arith.constant 0 : index
    %257 = vector.load %arg7[%c0_83, %c0_84] : memref<2x64xf32, #tpu.memory_space<vmem>>, vector<2x64xf32>
    %258 = arith.truncf %256 : vector<2x64xf32> to vector<2x64xbf16>
    %cst_85 = arith.constant dense<0.000000e+00> : vector<2x256xf32>
    %259 = tpu.matmul %258, %3, %cst_85 {dimension_numbers = #tpu.dot_dimension_numbers<[1], [0], [0], [1], [0, 0, 1, 1], [], []>} : vector<2x64xbf16>, vector<64x256xbf16>, vector<2x256xf32> -> vector<2x256xf32>
    %c7_i32_86 = arith.constant 7 : i32
    %260 = arith.subi %c7_i32_86, %c4_i32 : i32
    %261 = arith.index_cast %c4_i32 : i32 to index
    %c0_87 = arith.constant 0 : index
    %c0_88 = arith.constant 0 : index
    %262 = vector.load %arg1[%261, %c0_87, %c0_88] : memref<8x2x128xbf16, #tpu.memory_space<vmem>>, vector<1x2x128xbf16>
    %263 = vector.shape_cast %262 : vector<1x2x128xbf16> to vector<2x128xbf16>
    %264 = arith.extf %263 : vector<2x128xbf16> to vector<2x128xf32>
    %265 = vector.extract_strided_slice %259 {offsets = [0, 0], sizes = [2, 128], strides = [1, 1]} : vector<2x256xf32> to vector<2x128xf32>
    %266 = arith.addf %264, %265 : vector<2x128xf32>
    %267 = arith.index_cast %260 : i32 to index
    %c0_89 = arith.constant 0 : index
    %c0_90 = arith.constant 0 : index
    %268 = vector.load %arg2[%267, %c0_89, %c0_90] : memref<8x2x128xbf16, #tpu.memory_space<vmem>>, vector<1x2x128xbf16>
    %269 = vector.shape_cast %268 : vector<1x2x128xbf16> to vector<2x128xbf16>
    %270 = arith.extf %269 : vector<2x128xbf16> to vector<2x128xf32>
    %271 = vector.extract_strided_slice %259 {offsets = [0, 128], sizes = [2, 128], strides = [1, 1]} : vector<2x256xf32> to vector<2x128xf32>
    %272 = arith.addf %270, %271 : vector<2x128xf32>
    %273 = vector.extract_strided_slice %266 {offsets = [0, 0], sizes = [2, 96], strides = [1, 1]} : vector<2x128xf32> to vector<2x96xf32>
    %274 = arith.negf %273 : vector<2x96xf32>
    %275 = math.exp %274 : vector<2x96xf32>
    %cst_91 = arith.constant 1.000000e+00 : f32
    %276 = vector.broadcast %cst_91 : f32 to vector<2x96xf32>
    %277 = arith.addf %276, %275 : vector<2x96xf32>
    %278 = arith.divf %276, %277 : vector<2x96xf32>
    %279 = vector.extract_strided_slice %266 {offsets = [0, 96], sizes = [2, 32], strides = [1, 1]} : vector<2x128xf32> to vector<2x32xf32>
    %280 = math.tanh %279 : vector<2x32xf32>
    %281 = vector.extract_strided_slice %272 {offsets = [0, 0], sizes = [2, 96], strides = [1, 1]} : vector<2x128xf32> to vector<2x96xf32>
    %282 = arith.negf %281 : vector<2x96xf32>
    %283 = math.exp %282 : vector<2x96xf32>
    %cst_92 = arith.constant 1.000000e+00 : f32
    %284 = vector.broadcast %cst_92 : f32 to vector<2x96xf32>
    %285 = arith.addf %284, %283 : vector<2x96xf32>
    %286 = arith.divf %284, %285 : vector<2x96xf32>
    %287 = vector.extract_strided_slice %272 {offsets = [0, 96], sizes = [2, 32], strides = [1, 1]} : vector<2x128xf32> to vector<2x32xf32>
    %288 = math.tanh %287 : vector<2x32xf32>
    %289 = vector.extract_strided_slice %278 {offsets = [0, 32], sizes = [2, 32], strides = [1, 1]} : vector<2x96xf32> to vector<2x32xf32>
    %290 = vector.extract_strided_slice %257 {offsets = [0, 0], sizes = [2, 32], strides = [1, 1]} : vector<2x64xf32> to vector<2x32xf32>
    %291 = arith.mulf %289, %290 : vector<2x32xf32>
    %292 = vector.extract_strided_slice %278 {offsets = [0, 0], sizes = [2, 32], strides = [1, 1]} : vector<2x96xf32> to vector<2x32xf32>
    %293 = arith.mulf %292, %280 : vector<2x32xf32>
    %294 = arith.addf %291, %293 : vector<2x32xf32>
    %295 = vector.extract_strided_slice %286 {offsets = [0, 32], sizes = [2, 32], strides = [1, 1]} : vector<2x96xf32> to vector<2x32xf32>
    %296 = vector.extract_strided_slice %257 {offsets = [0, 32], sizes = [2, 32], strides = [1, 1]} : vector<2x64xf32> to vector<2x32xf32>
    %297 = arith.mulf %295, %296 : vector<2x32xf32>
    %298 = vector.extract_strided_slice %286 {offsets = [0, 0], sizes = [2, 32], strides = [1, 1]} : vector<2x96xf32> to vector<2x32xf32>
    %299 = arith.mulf %298, %288 : vector<2x32xf32>
    %300 = arith.addf %297, %299 : vector<2x32xf32>
    %301 = tpu.concatenate %294, %300 in 1 : vector<2x32xf32>, vector<2x32xf32> -> vector<2x64xf32>
    %302 = vector.extract_strided_slice %278 {offsets = [0, 64], sizes = [2, 32], strides = [1, 1]} : vector<2x96xf32> to vector<2x32xf32>
    %303 = vector.extract_strided_slice %286 {offsets = [0, 64], sizes = [2, 32], strides = [1, 1]} : vector<2x96xf32> to vector<2x32xf32>
    %304 = tpu.concatenate %302, %303 in 1 : vector<2x32xf32>, vector<2x32xf32> -> vector<2x64xf32>
    %305 = math.tanh %301 : vector<2x64xf32>
    %306 = arith.mulf %304, %305 : vector<2x64xf32>
    %c0_93 = arith.constant 0 : index
    %c0_94 = arith.constant 0 : index
    %307 = vector.load %arg7[%c0_93, %c0_94] : memref<2x64xf32, #tpu.memory_space<vmem>>, vector<2x64xf32>
    tpu.vector_store %arg7[%c0_93, %c0_94], %301 {strides = array<i32>} : memref<2x64xf32, #tpu.memory_space<vmem>>, vector<2x64xf32>,
    %c0_95 = arith.constant 0 : index
    %c0_96 = arith.constant 0 : index
    %308 = vector.load %arg6[%c0_95, %c0_96] : memref<2x64xf32, #tpu.memory_space<vmem>>, vector<2x64xf32>
    tpu.vector_store %arg6[%c0_95, %c0_96], %306 {strides = array<i32>} : memref<2x64xf32, #tpu.memory_space<vmem>>, vector<2x64xf32>,
    %309 = vector.extract_strided_slice %306 {offsets = [0, 0], sizes = [2, 32], strides = [1, 1]} : vector<2x64xf32> to vector<2x32xf32>
    %310 = arith.index_cast %c4_i32 : i32 to index
    %c0_97 = arith.constant 0 : index
    %c0_98 = arith.constant 0 : index
    %311 = vector.load %arg4[%310, %c0_97, %c0_98] : memref<8x2x32xf32, #tpu.memory_space<vmem>>, vector<1x2x32xf32>
    %312 = vector.shape_cast %311 : vector<1x2x32xf32> to vector<2x32xf32>
    %313 = vector.shape_cast %309 : vector<2x32xf32> to vector<1x2x32xf32>
    tpu.vector_store %arg4[%310, %c0_97, %c0_98], %313 {strides = array<i32>} : memref<8x2x32xf32, #tpu.memory_space<vmem>>, vector<1x2x32xf32>,
    %314 = vector.extract_strided_slice %306 {offsets = [0, 32], sizes = [2, 32], strides = [1, 1]} : vector<2x64xf32> to vector<2x32xf32>
    %315 = arith.index_cast %260 : i32 to index
    %c0_99 = arith.constant 0 : index
    %c0_100 = arith.constant 0 : index
    %316 = vector.load %arg5[%315, %c0_99, %c0_100] : memref<8x2x32xf32, #tpu.memory_space<vmem>>, vector<1x2x32xf32>
    %317 = vector.shape_cast %316 : vector<1x2x32xf32> to vector<2x32xf32>
    %318 = vector.shape_cast %314 : vector<2x32xf32> to vector<1x2x32xf32>
    tpu.vector_store %arg5[%315, %c0_99, %c0_100], %318 {strides = array<i32>} : memref<8x2x32xf32, #tpu.memory_space<vmem>>, vector<1x2x32xf32>,
    %c5_i32 = arith.constant 5 : i32
    %c0_101 = arith.constant 0 : index
    %c0_102 = arith.constant 0 : index
    %319 = vector.load %arg6[%c0_101, %c0_102] : memref<2x64xf32, #tpu.memory_space<vmem>>, vector<2x64xf32>
    %c0_103 = arith.constant 0 : index
    %c0_104 = arith.constant 0 : index
    %320 = vector.load %arg7[%c0_103, %c0_104] : memref<2x64xf32, #tpu.memory_space<vmem>>, vector<2x64xf32>
    %321 = arith.truncf %319 : vector<2x64xf32> to vector<2x64xbf16>
    %cst_105 = arith.constant dense<0.000000e+00> : vector<2x256xf32>
    %322 = tpu.matmul %321, %3, %cst_105 {dimension_numbers = #tpu.dot_dimension_numbers<[1], [0], [0], [1], [0, 0, 1, 1], [], []>} : vector<2x64xbf16>, vector<64x256xbf16>, vector<2x256xf32> -> vector<2x256xf32>
    %c7_i32_106 = arith.constant 7 : i32
    %323 = arith.subi %c7_i32_106, %c5_i32 : i32
    %324 = arith.index_cast %c5_i32 : i32 to index
    %c0_107 = arith.constant 0 : index
    %c0_108 = arith.constant 0 : index
    %325 = vector.load %arg1[%324, %c0_107, %c0_108] : memref<8x2x128xbf16, #tpu.memory_space<vmem>>, vector<1x2x128xbf16>
    %326 = vector.shape_cast %325 : vector<1x2x128xbf16> to vector<2x128xbf16>
    %327 = arith.extf %326 : vector<2x128xbf16> to vector<2x128xf32>
    %328 = vector.extract_strided_slice %322 {offsets = [0, 0], sizes = [2, 128], strides = [1, 1]} : vector<2x256xf32> to vector<2x128xf32>
    %329 = arith.addf %327, %328 : vector<2x128xf32>
    %330 = arith.index_cast %323 : i32 to index
    %c0_109 = arith.constant 0 : index
    %c0_110 = arith.constant 0 : index
    %331 = vector.load %arg2[%330, %c0_109, %c0_110] : memref<8x2x128xbf16, #tpu.memory_space<vmem>>, vector<1x2x128xbf16>
    %332 = vector.shape_cast %331 : vector<1x2x128xbf16> to vector<2x128xbf16>
    %333 = arith.extf %332 : vector<2x128xbf16> to vector<2x128xf32>
    %334 = vector.extract_strided_slice %322 {offsets = [0, 128], sizes = [2, 128], strides = [1, 1]} : vector<2x256xf32> to vector<2x128xf32>
    %335 = arith.addf %333, %334 : vector<2x128xf32>
    %336 = vector.extract_strided_slice %329 {offsets = [0, 0], sizes = [2, 96], strides = [1, 1]} : vector<2x128xf32> to vector<2x96xf32>
    %337 = arith.negf %336 : vector<2x96xf32>
    %338 = math.exp %337 : vector<2x96xf32>
    %cst_111 = arith.constant 1.000000e+00 : f32
    %339 = vector.broadcast %cst_111 : f32 to vector<2x96xf32>
    %340 = arith.addf %339, %338 : vector<2x96xf32>
    %341 = arith.divf %339, %340 : vector<2x96xf32>
    %342 = vector.extract_strided_slice %329 {offsets = [0, 96], sizes = [2, 32], strides = [1, 1]} : vector<2x128xf32> to vector<2x32xf32>
    %343 = math.tanh %342 : vector<2x32xf32>
    %344 = vector.extract_strided_slice %335 {offsets = [0, 0], sizes = [2, 96], strides = [1, 1]} : vector<2x128xf32> to vector<2x96xf32>
    %345 = arith.negf %344 : vector<2x96xf32>
    %346 = math.exp %345 : vector<2x96xf32>
    %cst_112 = arith.constant 1.000000e+00 : f32
    %347 = vector.broadcast %cst_112 : f32 to vector<2x96xf32>
    %348 = arith.addf %347, %346 : vector<2x96xf32>
    %349 = arith.divf %347, %348 : vector<2x96xf32>
    %350 = vector.extract_strided_slice %335 {offsets = [0, 96], sizes = [2, 32], strides = [1, 1]} : vector<2x128xf32> to vector<2x32xf32>
    %351 = math.tanh %350 : vector<2x32xf32>
    %352 = vector.extract_strided_slice %341 {offsets = [0, 32], sizes = [2, 32], strides = [1, 1]} : vector<2x96xf32> to vector<2x32xf32>
    %353 = vector.extract_strided_slice %320 {offsets = [0, 0], sizes = [2, 32], strides = [1, 1]} : vector<2x64xf32> to vector<2x32xf32>
    %354 = arith.mulf %352, %353 : vector<2x32xf32>
    %355 = vector.extract_strided_slice %341 {offsets = [0, 0], sizes = [2, 32], strides = [1, 1]} : vector<2x96xf32> to vector<2x32xf32>
    %356 = arith.mulf %355, %343 : vector<2x32xf32>
    %357 = arith.addf %354, %356 : vector<2x32xf32>
    %358 = vector.extract_strided_slice %349 {offsets = [0, 32], sizes = [2, 32], strides = [1, 1]} : vector<2x96xf32> to vector<2x32xf32>
    %359 = vector.extract_strided_slice %320 {offsets = [0, 32], sizes = [2, 32], strides = [1, 1]} : vector<2x64xf32> to vector<2x32xf32>
    %360 = arith.mulf %358, %359 : vector<2x32xf32>
    %361 = vector.extract_strided_slice %349 {offsets = [0, 0], sizes = [2, 32], strides = [1, 1]} : vector<2x96xf32> to vector<2x32xf32>
    %362 = arith.mulf %361, %351 : vector<2x32xf32>
    %363 = arith.addf %360, %362 : vector<2x32xf32>
    %364 = tpu.concatenate %357, %363 in 1 : vector<2x32xf32>, vector<2x32xf32> -> vector<2x64xf32>
    %365 = vector.extract_strided_slice %341 {offsets = [0, 64], sizes = [2, 32], strides = [1, 1]} : vector<2x96xf32> to vector<2x32xf32>
    %366 = vector.extract_strided_slice %349 {offsets = [0, 64], sizes = [2, 32], strides = [1, 1]} : vector<2x96xf32> to vector<2x32xf32>
    %367 = tpu.concatenate %365, %366 in 1 : vector<2x32xf32>, vector<2x32xf32> -> vector<2x64xf32>
    %368 = math.tanh %364 : vector<2x64xf32>
    %369 = arith.mulf %367, %368 : vector<2x64xf32>
    %c0_113 = arith.constant 0 : index
    %c0_114 = arith.constant 0 : index
    %370 = vector.load %arg7[%c0_113, %c0_114] : memref<2x64xf32, #tpu.memory_space<vmem>>, vector<2x64xf32>
    tpu.vector_store %arg7[%c0_113, %c0_114], %364 {strides = array<i32>} : memref<2x64xf32, #tpu.memory_space<vmem>>, vector<2x64xf32>,
    %c0_115 = arith.constant 0 : index
    %c0_116 = arith.constant 0 : index
    %371 = vector.load %arg6[%c0_115, %c0_116] : memref<2x64xf32, #tpu.memory_space<vmem>>, vector<2x64xf32>
    tpu.vector_store %arg6[%c0_115, %c0_116], %369 {strides = array<i32>} : memref<2x64xf32, #tpu.memory_space<vmem>>, vector<2x64xf32>,
    %372 = vector.extract_strided_slice %369 {offsets = [0, 0], sizes = [2, 32], strides = [1, 1]} : vector<2x64xf32> to vector<2x32xf32>
    %373 = arith.index_cast %c5_i32 : i32 to index
    %c0_117 = arith.constant 0 : index
    %c0_118 = arith.constant 0 : index
    %374 = vector.load %arg4[%373, %c0_117, %c0_118] : memref<8x2x32xf32, #tpu.memory_space<vmem>>, vector<1x2x32xf32>
    %375 = vector.shape_cast %374 : vector<1x2x32xf32> to vector<2x32xf32>
    %376 = vector.shape_cast %372 : vector<2x32xf32> to vector<1x2x32xf32>
    tpu.vector_store %arg4[%373, %c0_117, %c0_118], %376 {strides = array<i32>} : memref<8x2x32xf32, #tpu.memory_space<vmem>>, vector<1x2x32xf32>,
    %377 = vector.extract_strided_slice %369 {offsets = [0, 32], sizes = [2, 32], strides = [1, 1]} : vector<2x64xf32> to vector<2x32xf32>
    %378 = arith.index_cast %323 : i32 to index
    %c0_119 = arith.constant 0 : index
    %c0_120 = arith.constant 0 : index
    %379 = vector.load %arg5[%378, %c0_119, %c0_120] : memref<8x2x32xf32, #tpu.memory_space<vmem>>, vector<1x2x32xf32>
    %380 = vector.shape_cast %379 : vector<1x2x32xf32> to vector<2x32xf32>
    %381 = vector.shape_cast %377 : vector<2x32xf32> to vector<1x2x32xf32>
    tpu.vector_store %arg5[%378, %c0_119, %c0_120], %381 {strides = array<i32>} : memref<8x2x32xf32, #tpu.memory_space<vmem>>, vector<1x2x32xf32>,
    %c6_i32 = arith.constant 6 : i32
    %c0_121 = arith.constant 0 : index
    %c0_122 = arith.constant 0 : index
    %382 = vector.load %arg6[%c0_121, %c0_122] : memref<2x64xf32, #tpu.memory_space<vmem>>, vector<2x64xf32>
    %c0_123 = arith.constant 0 : index
    %c0_124 = arith.constant 0 : index
    %383 = vector.load %arg7[%c0_123, %c0_124] : memref<2x64xf32, #tpu.memory_space<vmem>>, vector<2x64xf32>
    %384 = arith.truncf %382 : vector<2x64xf32> to vector<2x64xbf16>
    %cst_125 = arith.constant dense<0.000000e+00> : vector<2x256xf32>
    %385 = tpu.matmul %384, %3, %cst_125 {dimension_numbers = #tpu.dot_dimension_numbers<[1], [0], [0], [1], [0, 0, 1, 1], [], []>} : vector<2x64xbf16>, vector<64x256xbf16>, vector<2x256xf32> -> vector<2x256xf32>
    %c7_i32_126 = arith.constant 7 : i32
    %386 = arith.subi %c7_i32_126, %c6_i32 : i32
    %387 = arith.index_cast %c6_i32 : i32 to index
    %c0_127 = arith.constant 0 : index
    %c0_128 = arith.constant 0 : index
    %388 = vector.load %arg1[%387, %c0_127, %c0_128] : memref<8x2x128xbf16, #tpu.memory_space<vmem>>, vector<1x2x128xbf16>
    %389 = vector.shape_cast %388 : vector<1x2x128xbf16> to vector<2x128xbf16>
    %390 = arith.extf %389 : vector<2x128xbf16> to vector<2x128xf32>
    %391 = vector.extract_strided_slice %385 {offsets = [0, 0], sizes = [2, 128], strides = [1, 1]} : vector<2x256xf32> to vector<2x128xf32>
    %392 = arith.addf %390, %391 : vector<2x128xf32>
    %393 = arith.index_cast %386 : i32 to index
    %c0_129 = arith.constant 0 : index
    %c0_130 = arith.constant 0 : index
    %394 = vector.load %arg2[%393, %c0_129, %c0_130] : memref<8x2x128xbf16, #tpu.memory_space<vmem>>, vector<1x2x128xbf16>
    %395 = vector.shape_cast %394 : vector<1x2x128xbf16> to vector<2x128xbf16>
    %396 = arith.extf %395 : vector<2x128xbf16> to vector<2x128xf32>
    %397 = vector.extract_strided_slice %385 {offsets = [0, 128], sizes = [2, 128], strides = [1, 1]} : vector<2x256xf32> to vector<2x128xf32>
    %398 = arith.addf %396, %397 : vector<2x128xf32>
    %399 = vector.extract_strided_slice %392 {offsets = [0, 0], sizes = [2, 96], strides = [1, 1]} : vector<2x128xf32> to vector<2x96xf32>
    %400 = arith.negf %399 : vector<2x96xf32>
    %401 = math.exp %400 : vector<2x96xf32>
    %cst_131 = arith.constant 1.000000e+00 : f32
    %402 = vector.broadcast %cst_131 : f32 to vector<2x96xf32>
    %403 = arith.addf %402, %401 : vector<2x96xf32>
    %404 = arith.divf %402, %403 : vector<2x96xf32>
    %405 = vector.extract_strided_slice %392 {offsets = [0, 96], sizes = [2, 32], strides = [1, 1]} : vector<2x128xf32> to vector<2x32xf32>
    %406 = math.tanh %405 : vector<2x32xf32>
    %407 = vector.extract_strided_slice %398 {offsets = [0, 0], sizes = [2, 96], strides = [1, 1]} : vector<2x128xf32> to vector<2x96xf32>
    %408 = arith.negf %407 : vector<2x96xf32>
    %409 = math.exp %408 : vector<2x96xf32>
    %cst_132 = arith.constant 1.000000e+00 : f32
    %410 = vector.broadcast %cst_132 : f32 to vector<2x96xf32>
    %411 = arith.addf %410, %409 : vector<2x96xf32>
    %412 = arith.divf %410, %411 : vector<2x96xf32>
    %413 = vector.extract_strided_slice %398 {offsets = [0, 96], sizes = [2, 32], strides = [1, 1]} : vector<2x128xf32> to vector<2x32xf32>
    %414 = math.tanh %413 : vector<2x32xf32>
    %415 = vector.extract_strided_slice %404 {offsets = [0, 32], sizes = [2, 32], strides = [1, 1]} : vector<2x96xf32> to vector<2x32xf32>
    %416 = vector.extract_strided_slice %383 {offsets = [0, 0], sizes = [2, 32], strides = [1, 1]} : vector<2x64xf32> to vector<2x32xf32>
    %417 = arith.mulf %415, %416 : vector<2x32xf32>
    %418 = vector.extract_strided_slice %404 {offsets = [0, 0], sizes = [2, 32], strides = [1, 1]} : vector<2x96xf32> to vector<2x32xf32>
    %419 = arith.mulf %418, %406 : vector<2x32xf32>
    %420 = arith.addf %417, %419 : vector<2x32xf32>
    %421 = vector.extract_strided_slice %412 {offsets = [0, 32], sizes = [2, 32], strides = [1, 1]} : vector<2x96xf32> to vector<2x32xf32>
    %422 = vector.extract_strided_slice %383 {offsets = [0, 32], sizes = [2, 32], strides = [1, 1]} : vector<2x64xf32> to vector<2x32xf32>
    %423 = arith.mulf %421, %422 : vector<2x32xf32>
    %424 = vector.extract_strided_slice %412 {offsets = [0, 0], sizes = [2, 32], strides = [1, 1]} : vector<2x96xf32> to vector<2x32xf32>
    %425 = arith.mulf %424, %414 : vector<2x32xf32>
    %426 = arith.addf %423, %425 : vector<2x32xf32>
    %427 = tpu.concatenate %420, %426 in 1 : vector<2x32xf32>, vector<2x32xf32> -> vector<2x64xf32>
    %428 = vector.extract_strided_slice %404 {offsets = [0, 64], sizes = [2, 32], strides = [1, 1]} : vector<2x96xf32> to vector<2x32xf32>
    %429 = vector.extract_strided_slice %412 {offsets = [0, 64], sizes = [2, 32], strides = [1, 1]} : vector<2x96xf32> to vector<2x32xf32>
    %430 = tpu.concatenate %428, %429 in 1 : vector<2x32xf32>, vector<2x32xf32> -> vector<2x64xf32>
    %431 = math.tanh %427 : vector<2x64xf32>
    %432 = arith.mulf %430, %431 : vector<2x64xf32>
    %c0_133 = arith.constant 0 : index
    %c0_134 = arith.constant 0 : index
    %433 = vector.load %arg7[%c0_133, %c0_134] : memref<2x64xf32, #tpu.memory_space<vmem>>, vector<2x64xf32>
    tpu.vector_store %arg7[%c0_133, %c0_134], %427 {strides = array<i32>} : memref<2x64xf32, #tpu.memory_space<vmem>>, vector<2x64xf32>,
    %c0_135 = arith.constant 0 : index
    %c0_136 = arith.constant 0 : index
    %434 = vector.load %arg6[%c0_135, %c0_136] : memref<2x64xf32, #tpu.memory_space<vmem>>, vector<2x64xf32>
    tpu.vector_store %arg6[%c0_135, %c0_136], %432 {strides = array<i32>} : memref<2x64xf32, #tpu.memory_space<vmem>>, vector<2x64xf32>,
    %435 = vector.extract_strided_slice %432 {offsets = [0, 0], sizes = [2, 32], strides = [1, 1]} : vector<2x64xf32> to vector<2x32xf32>
    %436 = arith.index_cast %c6_i32 : i32 to index
    %c0_137 = arith.constant 0 : index
    %c0_138 = arith.constant 0 : index
    %437 = vector.load %arg4[%436, %c0_137, %c0_138] : memref<8x2x32xf32, #tpu.memory_space<vmem>>, vector<1x2x32xf32>
    %438 = vector.shape_cast %437 : vector<1x2x32xf32> to vector<2x32xf32>
    %439 = vector.shape_cast %435 : vector<2x32xf32> to vector<1x2x32xf32>
    tpu.vector_store %arg4[%436, %c0_137, %c0_138], %439 {strides = array<i32>} : memref<8x2x32xf32, #tpu.memory_space<vmem>>, vector<1x2x32xf32>,
    %440 = vector.extract_strided_slice %432 {offsets = [0, 32], sizes = [2, 32], strides = [1, 1]} : vector<2x64xf32> to vector<2x32xf32>
    %441 = arith.index_cast %386 : i32 to index
    %c0_139 = arith.constant 0 : index
    %c0_140 = arith.constant 0 : index
    %442 = vector.load %arg5[%441, %c0_139, %c0_140] : memref<8x2x32xf32, #tpu.memory_space<vmem>>, vector<1x2x32xf32>
    %443 = vector.shape_cast %442 : vector<1x2x32xf32> to vector<2x32xf32>
    %444 = vector.shape_cast %440 : vector<2x32xf32> to vector<1x2x32xf32>
    tpu.vector_store %arg5[%441, %c0_139, %c0_140], %444 {strides = array<i32>} : memref<8x2x32xf32, #tpu.memory_space<vmem>>, vector<1x2x32xf32>,
    %c7_i32_141 = arith.constant 7 : i32
    %c0_142 = arith.constant 0 : index
    %c0_143 = arith.constant 0 : index
    %445 = vector.load %arg6[%c0_142, %c0_143] : memref<2x64xf32, #tpu.memory_space<vmem>>, vector<2x64xf32>
    %c0_144 = arith.constant 0 : index
    %c0_145 = arith.constant 0 : index
    %446 = vector.load %arg7[%c0_144, %c0_145] : memref<2x64xf32, #tpu.memory_space<vmem>>, vector<2x64xf32>
    %447 = arith.truncf %445 : vector<2x64xf32> to vector<2x64xbf16>
    %cst_146 = arith.constant dense<0.000000e+00> : vector<2x256xf32>
    %448 = tpu.matmul %447, %3, %cst_146 {dimension_numbers = #tpu.dot_dimension_numbers<[1], [0], [0], [1], [0, 0, 1, 1], [], []>} : vector<2x64xbf16>, vector<64x256xbf16>, vector<2x256xf32> -> vector<2x256xf32>
    %c7_i32_147 = arith.constant 7 : i32
    %449 = arith.subi %c7_i32_147, %c7_i32_141 : i32
    %450 = arith.index_cast %c7_i32_141 : i32 to index
    %c0_148 = arith.constant 0 : index
    %c0_149 = arith.constant 0 : index
    %451 = vector.load %arg1[%450, %c0_148, %c0_149] : memref<8x2x128xbf16, #tpu.memory_space<vmem>>, vector<1x2x128xbf16>
    %452 = vector.shape_cast %451 : vector<1x2x128xbf16> to vector<2x128xbf16>
    %453 = arith.extf %452 : vector<2x128xbf16> to vector<2x128xf32>
    %454 = vector.extract_strided_slice %448 {offsets = [0, 0], sizes = [2, 128], strides = [1, 1]} : vector<2x256xf32> to vector<2x128xf32>
    %455 = arith.addf %453, %454 : vector<2x128xf32>
    %456 = arith.index_cast %449 : i32 to index
    %c0_150 = arith.constant 0 : index
    %c0_151 = arith.constant 0 : index
    %457 = vector.load %arg2[%456, %c0_150, %c0_151] : memref<8x2x128xbf16, #tpu.memory_space<vmem>>, vector<1x2x128xbf16>
    %458 = vector.shape_cast %457 : vector<1x2x128xbf16> to vector<2x128xbf16>
    %459 = arith.extf %458 : vector<2x128xbf16> to vector<2x128xf32>
    %460 = vector.extract_strided_slice %448 {offsets = [0, 128], sizes = [2, 128], strides = [1, 1]} : vector<2x256xf32> to vector<2x128xf32>
    %461 = arith.addf %459, %460 : vector<2x128xf32>
    %462 = vector.extract_strided_slice %455 {offsets = [0, 0], sizes = [2, 96], strides = [1, 1]} : vector<2x128xf32> to vector<2x96xf32>
    %463 = arith.negf %462 : vector<2x96xf32>
    %464 = math.exp %463 : vector<2x96xf32>
    %cst_152 = arith.constant 1.000000e+00 : f32
    %465 = vector.broadcast %cst_152 : f32 to vector<2x96xf32>
    %466 = arith.addf %465, %464 : vector<2x96xf32>
    %467 = arith.divf %465, %466 : vector<2x96xf32>
    %468 = vector.extract_strided_slice %455 {offsets = [0, 96], sizes = [2, 32], strides = [1, 1]} : vector<2x128xf32> to vector<2x32xf32>
    %469 = math.tanh %468 : vector<2x32xf32>
    %470 = vector.extract_strided_slice %461 {offsets = [0, 0], sizes = [2, 96], strides = [1, 1]} : vector<2x128xf32> to vector<2x96xf32>
    %471 = arith.negf %470 : vector<2x96xf32>
    %472 = math.exp %471 : vector<2x96xf32>
    %cst_153 = arith.constant 1.000000e+00 : f32
    %473 = vector.broadcast %cst_153 : f32 to vector<2x96xf32>
    %474 = arith.addf %473, %472 : vector<2x96xf32>
    %475 = arith.divf %473, %474 : vector<2x96xf32>
    %476 = vector.extract_strided_slice %461 {offsets = [0, 96], sizes = [2, 32], strides = [1, 1]} : vector<2x128xf32> to vector<2x32xf32>
    %477 = math.tanh %476 : vector<2x32xf32>
    %478 = vector.extract_strided_slice %467 {offsets = [0, 32], sizes = [2, 32], strides = [1, 1]} : vector<2x96xf32> to vector<2x32xf32>
    %479 = vector.extract_strided_slice %446 {offsets = [0, 0], sizes = [2, 32], strides = [1, 1]} : vector<2x64xf32> to vector<2x32xf32>
    %480 = arith.mulf %478, %479 : vector<2x32xf32>
    %481 = vector.extract_strided_slice %467 {offsets = [0, 0], sizes = [2, 32], strides = [1, 1]} : vector<2x96xf32> to vector<2x32xf32>
    %482 = arith.mulf %481, %469 : vector<2x32xf32>
    %483 = arith.addf %480, %482 : vector<2x32xf32>
    %484 = vector.extract_strided_slice %475 {offsets = [0, 32], sizes = [2, 32], strides = [1, 1]} : vector<2x96xf32> to vector<2x32xf32>
    %485 = vector.extract_strided_slice %446 {offsets = [0, 32], sizes = [2, 32], strides = [1, 1]} : vector<2x64xf32> to vector<2x32xf32>
    %486 = arith.mulf %484, %485 : vector<2x32xf32>
    %487 = vector.extract_strided_slice %475 {offsets = [0, 0], sizes = [2, 32], strides = [1, 1]} : vector<2x96xf32> to vector<2x32xf32>
    %488 = arith.mulf %487, %477 : vector<2x32xf32>
    %489 = arith.addf %486, %488 : vector<2x32xf32>
    %490 = tpu.concatenate %483, %489 in 1 : vector<2x32xf32>, vector<2x32xf32> -> vector<2x64xf32>
    %491 = vector.extract_strided_slice %467 {offsets = [0, 64], sizes = [2, 32], strides = [1, 1]} : vector<2x96xf32> to vector<2x32xf32>
    %492 = vector.extract_strided_slice %475 {offsets = [0, 64], sizes = [2, 32], strides = [1, 1]} : vector<2x96xf32> to vector<2x32xf32>
    %493 = tpu.concatenate %491, %492 in 1 : vector<2x32xf32>, vector<2x32xf32> -> vector<2x64xf32>
    %494 = math.tanh %490 : vector<2x64xf32>
    %495 = arith.mulf %493, %494 : vector<2x64xf32>
    %c0_154 = arith.constant 0 : index
    %c0_155 = arith.constant 0 : index
    %496 = vector.load %arg7[%c0_154, %c0_155] : memref<2x64xf32, #tpu.memory_space<vmem>>, vector<2x64xf32>
    tpu.vector_store %arg7[%c0_154, %c0_155], %490 {strides = array<i32>} : memref<2x64xf32, #tpu.memory_space<vmem>>, vector<2x64xf32>,
    %c0_156 = arith.constant 0 : index
    %c0_157 = arith.constant 0 : index
    %497 = vector.load %arg6[%c0_156, %c0_157] : memref<2x64xf32, #tpu.memory_space<vmem>>, vector<2x64xf32>
    tpu.vector_store %arg6[%c0_156, %c0_157], %495 {strides = array<i32>} : memref<2x64xf32, #tpu.memory_space<vmem>>, vector<2x64xf32>,
    %498 = vector.extract_strided_slice %495 {offsets = [0, 0], sizes = [2, 32], strides = [1, 1]} : vector<2x64xf32> to vector<2x32xf32>
    %499 = arith.index_cast %c7_i32_141 : i32 to index
    %c0_158 = arith.constant 0 : index
    %c0_159 = arith.constant 0 : index
    %500 = vector.load %arg4[%499, %c0_158, %c0_159] : memref<8x2x32xf32, #tpu.memory_space<vmem>>, vector<1x2x32xf32>
    %501 = vector.shape_cast %500 : vector<1x2x32xf32> to vector<2x32xf32>
    %502 = vector.shape_cast %498 : vector<2x32xf32> to vector<1x2x32xf32>
    tpu.vector_store %arg4[%499, %c0_158, %c0_159], %502 {strides = array<i32>} : memref<8x2x32xf32, #tpu.memory_space<vmem>>, vector<1x2x32xf32>,
    %503 = vector.extract_strided_slice %495 {offsets = [0, 32], sizes = [2, 32], strides = [1, 1]} : vector<2x64xf32> to vector<2x32xf32>
    %504 = arith.index_cast %449 : i32 to index
    %c0_160 = arith.constant 0 : index
    %c0_161 = arith.constant 0 : index
    %505 = vector.load %arg5[%504, %c0_160, %c0_161] : memref<8x2x32xf32, #tpu.memory_space<vmem>>, vector<1x2x32xf32>
    %506 = vector.shape_cast %505 : vector<1x2x32xf32> to vector<2x32xf32>
    %507 = vector.shape_cast %503 : vector<2x32xf32> to vector<1x2x32xf32>
    tpu.vector_store %arg5[%504, %c0_160, %c0_161], %507 {strides = array<i32>} : memref<8x2x32xf32, #tpu.memory_space<vmem>>, vector<1x2x32xf32>,
    %c8_i32 = arith.constant 8 : i32
    return
  }
  func.func @transform_0(%arg0: i32) -> (i32, i32, i32) {
    %c0_i32 = arith.constant 0 : i32
    %c0_i32_0 = arith.constant 0 : i32
    %c0_i32_1 = arith.constant 0 : i32
    return %arg0, %c0_i32, %c0_i32_0 : i32, i32, i32
  }
  func.func @transform_1(%arg0: i32) -> (i32, i32, i32) {
    %c0_i32 = arith.constant 0 : i32
    %0 = arith.subi %c0_i32, %arg0 : i32
    %c0_i32_0 = arith.constant 0 : i32
    %c0_i32_1 = arith.constant 0 : i32
    %c0_i32_2 = arith.constant 0 : i32
    return %0, %c0_i32_0, %c0_i32_1 : i32, i32, i32
  }
  func.func @transform_2(%arg0: i32) -> (i32, i32) {
    %c0_i32 = arith.constant 0 : i32
    %c0_i32_0 = arith.constant 0 : i32
    %c0_i32_1 = arith.constant 0 : i32
    return %c0_i32, %c0_i32_0 : i32, i32
  }
  func.func @transform_3(%arg0: i32) -> (i32, i32, i32) {
    %c0_i32 = arith.constant 0 : i32
    %c0_i32_0 = arith.constant 0 : i32
    %c0_i32_1 = arith.constant 0 : i32
    return %arg0, %c0_i32, %c0_i32_0 : i32, i32, i32
  }
  func.func @transform_4(%arg0: i32) -> (i32, i32, i32) {
    %c0_i32 = arith.constant 0 : i32
    %0 = arith.subi %c0_i32, %arg0 : i32
    %c0_i32_0 = arith.constant 0 : i32
    %c0_i32_1 = arith.constant 0 : i32
    %c0_i32_2 = arith.constant 0 : i32
    return %0, %c0_i32_0, %c0_i32_1 : i32, i32, i32
  }
}

module attributes {stable_mosaic.version = 11 : i64} {
  func.func @_head_kernel(%arg0: memref<2x64xf32, #tpu.memory_space<vmem>>, %arg1: memref<2x8xf32, #tpu.memory_space<vmem>>, %arg2: memref<1x64xf32, #tpu.memory_space<vmem>>, %arg3: memref<1x64xf32, #tpu.memory_space<vmem>>, %arg4: memref<64x8xf32, #tpu.memory_space<vmem>>, %arg5: memref<1x8xf32, #tpu.memory_space<vmem>>, %arg6: memref<2x8xf32, #tpu.memory_space<vmem>>, %arg7: memref<1x1xf32, #tpu.memory_space<vmem>>) attributes {dimension_semantics = [], scalar_prefetch = 0 : i64, scratch_operands = 0 : i64, tpu.core_type = #tpu.core_type<tc>} {
    %c0 = arith.constant 0 : index
    %c0_0 = arith.constant 0 : index
    %0 = vector.load %arg0[%c0, %c0_0] : memref<2x64xf32, #tpu.memory_space<vmem>>, vector<2x64xf32>
    %cst = arith.constant dense<0.000000e+00> : vector<2xf32>
    %1 = vector.multi_reduction <add>, %0, %cst [1] : vector<2x64xf32> to vector<2xf32>
    %2 = vector.shape_cast %1 : vector<2xf32> to vector<2x1xf32>
    %cst_1 = arith.constant 6.400000e+01 : f32
    %3 = vector.broadcast %cst_1 : f32 to vector<2x1xf32>
    %4 = arith.divf %2, %3 : vector<2x1xf32>
    %5 = vector.broadcast %4 : vector<2x1xf32> to vector<2x64xf32>
    %6 = arith.subf %0, %5 : vector<2x64xf32>
    %7 = vector.broadcast %4 : vector<2x1xf32> to vector<2x64xf32>
    %8 = arith.subf %0, %7 : vector<2x64xf32>
    %9 = arith.mulf %6, %8 : vector<2x64xf32>
    %cst_2 = arith.constant dense<0.000000e+00> : vector<2xf32>
    %10 = vector.multi_reduction <add>, %9, %cst_2 [1] : vector<2x64xf32> to vector<2xf32>
    %11 = vector.shape_cast %10 : vector<2xf32> to vector<2x1xf32>
    %cst_3 = arith.constant 6.400000e+01 : f32
    %12 = vector.broadcast %cst_3 : f32 to vector<2x1xf32>
    %13 = arith.divf %11, %12 : vector<2x1xf32>
    %14 = vector.broadcast %4 : vector<2x1xf32> to vector<2x64xf32>
    %15 = arith.subf %0, %14 : vector<2x64xf32>
    %cst_4 = arith.constant 9.99999974E-6 : f32
    %16 = vector.broadcast %cst_4 : f32 to vector<2x1xf32>
    %17 = arith.addf %13, %16 : vector<2x1xf32>
    %18 = math.rsqrt %17 : vector<2x1xf32>
    %19 = vector.broadcast %18 : vector<2x1xf32> to vector<2x64xf32>
    %20 = arith.mulf %15, %19 : vector<2x64xf32>
    %c0_5 = arith.constant 0 : index
    %c0_6 = arith.constant 0 : index
    %21 = vector.load %arg2[%c0_5, %c0_6] : memref<1x64xf32, #tpu.memory_space<vmem>>, vector<1x64xf32>
    %22 = vector.broadcast %21 : vector<1x64xf32> to vector<2x64xf32>
    %23 = arith.mulf %20, %22 : vector<2x64xf32>
    %c0_7 = arith.constant 0 : index
    %c0_8 = arith.constant 0 : index
    %24 = vector.load %arg3[%c0_7, %c0_8] : memref<1x64xf32, #tpu.memory_space<vmem>>, vector<1x64xf32>
    %25 = vector.broadcast %24 : vector<1x64xf32> to vector<2x64xf32>
    %26 = arith.addf %23, %25 : vector<2x64xf32>
    %c0_9 = arith.constant 0 : index
    %c0_10 = arith.constant 0 : index
    %27 = vector.load %arg4[%c0_9, %c0_10] : memref<64x8xf32, #tpu.memory_space<vmem>>, vector<64x8xf32>
    %cst_11 = arith.constant dense<0.000000e+00> : vector<2x8xf32>
    %28 = tpu.matmul %26, %27, %cst_11 {dimension_numbers = #tpu.dot_dimension_numbers<[1], [0], [0], [1], [0, 0, 1, 1], [], []>} : vector<2x64xf32>, vector<64x8xf32>, vector<2x8xf32> -> vector<2x8xf32>
    %c0_12 = arith.constant 0 : index
    %c0_13 = arith.constant 0 : index
    %29 = vector.load %arg5[%c0_12, %c0_13] : memref<1x8xf32, #tpu.memory_space<vmem>>, vector<1x8xf32>
    %30 = vector.broadcast %29 : vector<1x8xf32> to vector<2x8xf32>
    %31 = arith.addf %28, %30 : vector<2x8xf32>
    %c0_14 = arith.constant 0 : index
    %c0_15 = arith.constant 0 : index
    %32 = vector.load %arg6[%c0_14, %c0_15] : memref<2x8xf32, #tpu.memory_space<vmem>>, vector<2x8xf32>
    tpu.vector_store %arg6[%c0_14, %c0_15], %31 {strides = array<i32>} : memref<2x8xf32, #tpu.memory_space<vmem>>, vector<2x8xf32>,
    %c0_16 = arith.constant 0 : index
    %c0_17 = arith.constant 0 : index
    %33 = vector.load %arg1[%c0_16, %c0_17] : memref<2x8xf32, #tpu.memory_space<vmem>>, vector<2x8xf32>
    %34 = arith.subf %31, %33 : vector<2x8xf32>
    %35 = arith.mulf %34, %34 : vector<2x8xf32>
    %36 = vector.shape_cast %35 : vector<2x8xf32> to vector<1x2x8xf32>
    %cst_18 = arith.constant dense<0.000000e+00> : vector<1xf32>
    %37 = vector.multi_reduction <add>, %36, %cst_18 [1, 2] : vector<1x2x8xf32> to vector<1xf32>
    %38 = vector.shape_cast %37 : vector<1xf32> to vector<1x1x1xf32>
    %39 = vector.extract %38[0, 0, 0] : f32 from vector<1x1x1xf32>
    %cst_19 = arith.constant 1.600000e+01 : f32
    %40 = arith.divf %39, %cst_19 : f32
    %41 = vector.broadcast %40 : f32 to vector<1x1xf32>
    %c0_20 = arith.constant 0 : index
    %c0_21 = arith.constant 0 : index
    %42 = vector.load %arg7[%c0_20, %c0_21] : memref<1x1xf32, #tpu.memory_space<vmem>>, vector<1x1xf32>
    tpu.vector_store %arg7[%c0_20, %c0_21], %41 {strides = array<i32>} : memref<1x1xf32, #tpu.memory_space<vmem>>, vector<1x1xf32>,
    return
  }
}

</mosaic_0001>

<bundles_post_ra>
// kernel: rnn_model_forward.7
= control target key start
LH: loop header
LB: loop body
LE: loop exit
PB: predicated region body
PF: predicated region fallthrough
CT: control target
= control target key end

     0   :  { %v217_v2 = vmov 0   ;;  %s218_s28 = smov 32   ;;  %vm32_vm0 = vcmask 261120   ;;  %vm96_vm1 = vcmask 523264   ;;  %v46_v20 = vlaneseq  ;;  %s294_s1 = inlined_call_operand.vmem [shape: f32[16,32], index: 1, kind: input, shape index: {}]   ;;  %s295_s2 = inlined_call_operand.vmem [shape: bf16[64,256], index: 2, kind: input, shape index: {}]   ;;  %s296_s0 = inlined_call_operand.vmem [shape: f32[16,32], index: 0, kind: input, shape index: {}]   ;;  %s297_s3 = inlined_call_operand.vmem [shape: f32[1,256], index: 3, kind: input, shape index: {}]   ;;  %s298_s4 = inlined_call_operand.vmem [shape: bf16[16,128], index: 4, kind: output, shape index: {0}]   ;;  %s299_s5 = inlined_call_operand.vmem [shape: bf16[16,128], index: 5, kind: output, shape index: {1}]  }
   0x1   :  { %v22_v0 = vld [vmem:[%s294_s1] sm:$0xff]  ;;  %v23_v1 = vld [vmem:[%s294_s1 + $0x8] sm:$0xff]  ;;  %132 = vmatprep.mubr.bf16.mxu0 %v217_v2  ;;  %v208_v6 = vld [vmem:[%s295_s2 + $0x14] ss:$8 sps:$4 sm:$0xff]  }
   0x2   :  { %v200_v3 = vpack.i.bf16 %v23_v1, %v22_v0  ;;  %v205_v4 = vld [vmem:[%s295_s2 + $0x4] ss:$8 sps:$4 sm:$0xff]   ;;  %v207_v5 = vld [vmem:[%s295_s2] ss:$8 sps:$4 sm:$0xff]   ;;  %v210_v7 = vld [vmem:[%s295_s2 + $0x10] ss:$8 sps:$4 sm:$0xff]  }
   0x3   :  { %100 = vmatprep.subr.bf16.mxu0 %v205_v4  ;;  %v211_v8 = vld [vmem:[%s295_s2 + $0x24] ss:$8 sps:$4 sm:$0xff]   ;;  %v213_v9 = vld [vmem:[%s295_s2 + $0x20] ss:$8 sps:$4 sm:$0xff]   ;;  %v214_v10 = vld [vmem:[%s295_s2 + $0x34] ss:$8 sps:$4 sm:$0xff]  }
   0x4   :  { %201 = vrot.lane.b32.xlu0 %v200_v3, %s218_s28  ;;  %101 = vmatpush1.bf16.msra.mxu0 %v207_v5  ;;  %v216_v11 = vld [vmem:[%s295_s2 + $0x30] ss:$8 sps:$4 sm:$0xff]   ;;  %v20_v13 = vld [vmem:[%s296_s0] sm:$0xff]  ;;  %v21_v14 = vld [vmem:[%s296_s0 + $0x8] sm:$0xff]  ;;  %v47_v21 = vshrl.u32 %v46_v20, 7 }
   0x5   :  { %102 = vmatprep.subr.bf16.mxu0 %v208_v6  ;;  %v44_v23 = vld [vmem:[%s297_s3] sm:$0x3] }
   0x6   :  { %v48_v22 = vsub.s32 0, %v47_v21  ;;  %v52_v24 = vsub.s32 1, %v47_v21 }
   0x8   :  { %103 = vmatpush1.bf16.msra.mxu0 %v210_v7  ;;  %v49_v25 = vrot.slane %v44_v23, %v48_v22  ;;  %v53_v27 = vrot.slane %v44_v23, %v52_v24 }
   0x9   :  { %104 = vmatprep.subr.bf16.mxu0 %v211_v8 }
   0xc   :  { %105 = vmatpush1.bf16.msra.mxu0 %v213_v9 }
   0xd   :  { %106 = vmatprep.subr.bf16.mxu0 %v214_v10 }
  0x10   :  { %107 = vmatpush1.bf16.msra.mxu0 %v216_v11 }
  0x76   :  { %v202_v12 = vpop.permute.xlu0 %201 }
  0x77   :  { %v204_v15 = vunpack.i.h.bf16 %v202_v12  ;;  %v203_v16 = vunpack.i.l.bf16 %v202_v12 }
  0x79   :  { %v33_v17 = vsel %vm32_vm0, %v20_v13, %v203_v16  ;;  %v34_v18 = vsel %vm32_vm0, %v21_v14, %v204_v15 }
  0x7a   :  { %v35_v19 = vpack.c.bf16 %v34_v18, %v33_v17 }
  0x7c   :  { %179 = vmatmul.mubr.msk.bf16.vlgmr.msra.gmra.mrb[0].mxu0 %vm96_vm1, %v35_v19 }
 0x14f   :  { %v134_v26 = vpop.f32.mrb[0].mxu0 }
 0x150   :  { %v136_v28 = vpop.f32.mrb[1].mxu0  ;;  %v135_v30 = vadd.f32 %v134_v26, %v49_v25 }
 0x151   :  { %v138_v29 = vpop.f32.mrb[2].mxu0  ;;  %v137_v33 = vadd.f32 %v136_v28, %v53_v27 }
 0x152   :  { %v139_v31 = vadd.f32 %v138_v29, %v49_v25  ;;  %v140_v32 = vpop.f32.mrb[3].mxu0 }
 0x153   :  { %v141_v34 = vadd.f32 %v140_v32, %v53_v27 }
 0x154   :  { %v191_v35 = vpack.c.bf16 %v139_v31, %v135_v30 }
 0x155   :  { %v196_v36 = vpack.c.bf16 %v141_v34, %v137_v33 }
 0x156   :  { %192 = vst [vmem:[%s298_s4] sm:$0xff] %v191_v35  }
 0x157   :  { %197 = vst [vmem:[%s299_s5] sm:$0xff] %v196_v36  }

// kernel: rnn_model_forward.5
= control target key start
LH: loop header
LB: loop body
LE: loop exit
PB: predicated region body
PF: predicated region fallthrough
CT: control target
= control target key end

     0   :  { %v144_v1 = vmov 0   ;;  %vm44_vm0 = vcmask 130048   ;;  %v24_v6 = vlaneseq  ;;  %s191_s1 = inlined_call_operand.vmem [shape: bf16[16,256], index: 1, kind: input, shape index: {}]   ;;  %s192_s0 = inlined_call_operand.vmem [shape: f32[16,16], index: 0, kind: input, shape index: {}]   ;;  %s193_s2 = inlined_call_operand.vmem [shape: f32[1,256], index: 2, kind: input, shape index: {}]   ;;  %s194_s3 = inlined_call_operand.vmem [shape: bf16[16,128], index: 3, kind: output, shape index: {0}]   ;;  %s195_s4 = inlined_call_operand.vmem [shape: bf16[16,128], index: 4, kind: output, shape index: {1}]  }
   0x1   :  { %v141_v0 = vld [vmem:[%s191_s1 + $0x4] ss:$8 sps:$4 sm:$0xff]   ;;  %80 = vmatprep.mubr.bf16.mxu0 %v144_v1  ;;  %v143_v2 = vld [vmem:[%s191_s1] ss:$8 sps:$4 sm:$0xff]  }
   0x2   :  { %v17_v3 = vld [vmem:[%s192_s0] sm:$0xff]  ;;  %v18_v4 = vld [vmem:[%s192_s0 + $0x8] sm:$0xff]  ;;  %48 = vmatprep.subr.bf16.mxu0 %v141_v0  ;;  %v25_v7 = vshrl.u32 %v24_v6, 7 }
   0x3   :  { %v19_v5 = vpack.c.bf16 %v18_v4, %v17_v3  ;;  %49 = vmatpush1.bf16.msra.mxu0 %v143_v2  ;;  %v22_v9 = vld [vmem:[%s193_s2] sm:$0x3] }
   0x4   :  { %v26_v8 = vsub.s32 0, %v25_v7  ;;  %v30_v10 = vsub.s32 1, %v25_v7 }
   0x6   :  { %121 = vmatmul.mubr.msk.bf16.vlgmr.msra.gmra.mrb[0].mxu0 %vm44_vm0, %v19_v5  ;;  %v27_v11 = vrot.slane %v22_v9, %v26_v8  ;;  %v31_v13 = vrot.slane %v22_v9, %v30_v10 }
  0xd9   :  { %v82_v12 = vpop.f32.mrb[0].mxu0 }
  0xda   :  { %v84_v14 = vpop.f32.mrb[1].mxu0  ;;  %v83_v16 = vadd.f32 %v82_v12, %v27_v11 }
  0xdb   :  { %v86_v15 = vpop.f32.mrb[2].mxu0  ;;  %v85_v19 = vadd.f32 %v84_v14, %v31_v13 }
  0xdc   :  { %v87_v17 = vadd.f32 %v86_v15, %v27_v11  ;;  %v88_v18 = vpop.f32.mrb[3].mxu0 }
  0xdd   :  { %v89_v20 = vadd.f32 %v88_v18, %v31_v13 }
  0xde   :  { %v133_v21 = vpack.c.bf16 %v87_v17, %v83_v16 }
  0xdf   :  { %v138_v22 = vpack.c.bf16 %v89_v20, %v85_v19 }
  0xe0   :  { %134 = vst [vmem:[%s194_s3] sm:$0xff] %v133_v21  }
  0xe1   :  { %139 = vst [vmem:[%s195_s4] sm:$0xff] %v138_v22  }

// kernel: rnn_model_forward.9
= control target key start
LH: loop header
LB: loop body
LE: loop exit
PB: predicated region body
PF: predicated region fallthrough
CT: control target
= control target key end

     0   :  { %13 = vsyncpa [#allocation3], 0  ;;  %vm28_vm0 = vcmask 517120   ;;  %s406_s0 = inlined_call_operand.vmem [shape: f32[2,64], index: 0, kind: input, shape index: {}]   ;;  %s407_s1 = inlined_call_operand.vmem [shape: f32[2,8], index: 1, kind: input, shape index: {}]   ;;  %s408_s2 = inlined_call_operand.vmem [shape: f32[1,64], index: 2, kind: input, shape index: {}]   ;;  %s409_s3 = inlined_call_operand.vmem [shape: f32[1,64], index: 3, kind: input, shape index: {}]   ;;  %s410_s4 = inlined_call_operand.vmem [shape: f32[64,8], index: 4, kind: input, shape index: {}]   ;;  %s411_s5 = inlined_call_operand.vmem [shape: f32[1,8], index: 5, kind: input, shape index: {}]   ;;  %s412_s6 = inlined_call_operand.hbm [shape: f32[2,8], index: 6, kind: output, shape index: {0}]   ;;  %s413_s7 = inlined_call_operand.hbm [shape: f32[1,1], index: 7, kind: output, shape index: {1}]  }
   0x1   :  { %v27_v0 = vld [vmem:[%s406_s0] sm:$0x3] }
   0x2   :  { %14 = vsyncpa [#allocation5], 0  ;;  %v29_v1 = vsel %vm28_vm0, %v27_v0, 0.0  ;;  %v59_v7 = vld [vmem:[%s410_s4] sm:$0xff]  ;;  %v60_v8 = vld [vmem:[%s410_s4 + $0x8] sm:$0xff]  ;;  %v298_v12 = vmov 0.0|0.0  }
   0x3   :  { %30 = vadd.xlane.f32.xlu0 %v29_v1  ;;  %v230_v9 = vpack.c.bf16 %v60_v8, %v59_v7  ;;  %v61_v10 = vld [vmem:[%s410_s4 + $0x10] sm:$0xff]  ;;  %v62_v11 = vld [vmem:[%s410_s4 + $0x18] sm:$0xff]  ;;  %229 = vmatprep.subr.bf16.mxu0 %v298_v12  ;;  %vm299_vm1 = vmmov 0   ;;  %v300_v13 = vmov 0.0   ;;  %v63_v15 = vld [vmem:[%s410_s4 + $0x20] sm:$0xff]  ;;  %vm74_vm2 = vcmask 523264  }
   0x4   :  { %226 = vmatprep.mubr.msk.f32.mxu0 %vm299_vm1, %v300_v13  ;;  %v233_v14 = vpack.c.bf16 %v62_v11, %v61_v10  ;;  %v64_v16 = vld [vmem:[%s410_s4 + $0x28] sm:$0xff]  ;;  %v65_v18 = vld [vmem:[%s410_s4 + $0x30] sm:$0xff]  ;;  %v66_v19 = vld [vmem:[%s410_s4 + $0x38] sm:$0xff]  ;;  %vm148_vm3 = vcmask 58368  }
   0x5   :  { %231 = vmatpush3.bf16.msra.mxu0 %v230_v9  ;;  %v236_v17 = vpack.c.bf16 %v64_v16, %v63_v15  ;;  %v239_v20 = vpack.c.bf16 %v66_v19, %v65_v18  ;;  %v197_v25 = vld [vmem:[%s408_s2] ss:$0 sm:$0xff]  ;;  %s301_s2 = smov [#allocation2]  }
   0x6   :  { %232 = vmatprep.subr.bf16.mxu0 %v298_v12  ;;  %v198_v27 = vld [vmem:[%s409_s3] ss:$0 sm:$0xff]  ;;  %s175_s3 = sshll.u32 %s301_s2, 4  ;;  %s176_s3 = int_to_ptr.vmem [resolvable:$true] %s175_s3 }
   0x7   :  { %v199_v30 = vld [vmem:[%s411_s5] ss:$0 sm:$0xff]  ;;  %s250_s25 = scalar_lea.vmem %s176_s3, 32  ;;  %p255_p1 = scmp.lt.s32.totalorder %s176_s3, %s176_s3 }
   0x8   :  { %v150_v32 = vld [vmem:[%s407_s1] sm:$0x3]  ;;  %p251_p0 = scmp.ne.s32.totalorder %s176_s3, %s250_s25  ;;  %p256_p2 = scmp.lt.s32.totalorder %s250_s25, %s250_s25 }
   0x9   :  { %234 = vmatpush3.bf16.msra.mxu0 %v233_v14 }
   0xa   :  { %235 = vmatprep.subr.bf16.mxu0 %v298_v12  ;;  %p257_p3 = por %p256_p2, %p255_p1 }
   0xc   :  { %p258_p4 = pnand %p257_p3, %p251_p0 }
   0xd   :  { %237 = vmatpush3.bf16.msra.mxu0 %v236_v17 }
   0xe   :  { %238 = vmatprep.subr.bf16.mxu0 %v298_v12 }
  0x11   :  { %240 = vmatpush3.bf16.msra.mxu0 %v239_v20 }
  0x90   :  { %v31_v2 = vpop.xlane.xlu0 %30 }
  0x91   :  { %v33_v3 = vmul.f32 0.015625, %v31_v2 }
  0x93   :  { %v34_v4 = vsub.f32 %v27_v0, %v33_v3 }
  0x95   :  { %v35_v5 = vmul.f32 %v34_v4, %v34_v4 }
  0x97   :  { %v36_v6 = vsel %vm28_vm0, %v35_v5, 0.0 }
  0x98   :  { %37 = vadd.xlane.f32.xlu0 %v36_v6 }
 0x125   :  { %v38_v21 = vpop.xlane.xlu0 %37 }
 0x126   :  { %v39_v22 = vmul.f32 0.015625, %v38_v21 }
 0x128   :  { %v40_v23 = vadd.f32 1e-05, %v39_v22 }
 0x12a   :  { %248 = vrsqrt.f32 %v40_v23 }
 0x134   :  { %v249_v24 = vpop.eup %248 }
 0x135   :  { %v42_v26 = vmul.f32 %v249_v24, %v34_v4 }
 0x137   :  { %v50_v28 = vmul.f32 %v197_v25, %v42_v26 }
 0x139   :  { %v58_v29 = vadd.f32 %v198_v27, %v50_v28 }
 0x13b   :  { %227 = vmatmul.mubr.msk.f32.vlgmr.msra.gmra.mrb[0].mxu0 %vm74_vm2, %v58_v29 }
 0x20e   :  { %v144_v31 = vpop.f32.mrb[0].mxu0 }
 0x20f   :  { %v145_v33 = vadd.f32 %v199_v30, %v144_v31  ;;  %v228_v34 = vpop.f32.mrb[1].mxu0 }
 0x211   :  { %v151_v35 = vsub.f32 %v145_v33, %v150_v32  ;;  %149 = vst.msk [vmem:[#allocation2] sm:$0x3] %vm148_vm3, %v145_v33 }
 0x213   :  { %v152_v36 = vmul.f32 %v151_v35, %v151_v35 }
 0x215   :  { %v153_v37 = vsel %vm148_vm3, %v152_v36, 0.0 }
 0x216   :  { %154 = vadd.xlane.f32.xlu1 %v153_v37 }
 0x217   :  { %261 = shalt.err (!%p258_p4)
}
 0x218   :  { %s262_s1 = scalar_lea.hbm %s412_s6, 32 }
 0x219   :  { %p263_p5 = scmp.ne.s32.totalorder %s412_s6, %s262_s1  ;;  %p266_p6 = scmp.lt.u32.totalorder %s262_s1, %s412_s6 }
 0x21b   :  { %p268_p7 = pnand %p266_p6, %p263_p5 }
 0x21d   :  { %271 = shalt.err (!%p268_p7)
}
 0x21e   :  { %178 = dma.vmem_to_hbm [thread:$0]  %s176_s3, 32, %s412_s6, [#allocation3]   ;;  %vm167_vm4 = vcmask 0  }
 0x21f   :  { %s302_s9 = smov [#allocation4]  }
 0x220   :  { %s185_s10 = sshll.u32 %s302_s9, 4  ;;  %s186_s10 = int_to_ptr.vmem [resolvable:$true] %s185_s10 }
 0x221   :  { %s272_s13 = scalar_lea.vmem %s186_s10, 16  ;;  %s276_s14 = scalar_lea.vmem %s186_s10, 32 }
 0x222   :  { %p273_p8 = scmp.ne.s32.totalorder %s186_s10, %s272_s13  ;;  %p277_p9 = scmp.lt.s32.totalorder %s186_s10, %s186_s10 }
 0x223   :  { %p278_p10 = scmp.lt.s32.totalorder %s276_s14, %s272_s13 }
 0x225   :  { %p279_p11 = por %p278_p10, %p277_p9 }
 0x227   :  { %p280_p12 = pnand %p279_p11, %p273_p8 }
 0x2a3   :  { %v155_v38 = vpop.xlane.xlu1 %154 }
 0x2a4   :  { %v156_v39 = vrot.slane %v155_v38, 4 }
 0x2a6   :  { %v157_v40 = vadd.f32 %v156_v39, %v155_v38 }
 0x2a8   :  { %v158_v41 = vrot.slane %v157_v40, 2 }
 0x2aa   :  { %v159_v42 = vadd.f32 %v158_v41, %v157_v40 }
 0x2ac   :  { %v160_v43 = vrot.slane %v159_v42, 1 }
 0x2ae   :  { %v161_v44 = vadd.f32 %v160_v43, %v159_v42 }
 0x2b0   :  { %241 = vpush %v161_v44 }
 0x2e1   :  { %s242_s11 = spop %241 }
 0x2e2   :  { %s165_s12 = smul.f32 0.0625, %s242_s11 }
 0x2e4   :  { %v166_v45 = vstv %s165_s12 }
 0x2e5   :  { %168 = vst.msk [vmem:[#allocation4] sm:$0x1] %vm167_vm4, %v166_v45 }
 0x2e6   :  { %283 = shalt.err (!%p280_p12)
}
 0x2e7   :  { %s284_s16 = scalar_lea.hbm %s413_s7, 16 }
 0x2e8   :  { %p285_p13 = scmp.ne.s32.totalorder %s413_s7, %s284_s16  ;;  %p288_p0 = scmp.lt.u32.totalorder %s284_s16, %s413_s7 }
 0x2ea   :  { %p290_p1 = pnand %p288_p0, %p285_p13 }
 0x2ec   :  { %293 = shalt.err (!%p290_p1)
}
 0x2ed   :  { %188 = dma.vmem_to_hbm [thread:$0]  %s186_s10, 16, %s413_s7, [#allocation5]  }
 0x2ee   :  { %294 = dma.done.wait [#allocation3], 32  }
 0x2ef   :  { %295 = vsyncadd [#allocation3], 4294967264 }
 0x2f0   :  { %296 = dma.done.wait [#allocation5], 16  }
 0x2f1   :  { %297 = vsyncadd [#allocation5], 4294967280 }
 0x2f2   :  { %195 = vsyncpa [#allocation3], 1 }
 0x2f3   :  { %196 = vsyncpa [#allocation5], 1 }

// kernel: rnn_model_forward.6
= control target key start
LH: loop header
LB: loop body
LE: loop exit
PB: predicated region body
PF: predicated region fallthrough
CT: control target
= control target key end

     0   :  { %vm54_vm0 = vcmask 517120   ;;  %v1520_v1 = vmov 0   ;;  %v1521_v2 = vmov 0.0   ;;  %vm108_vm1 = vcmask 523264   ;;  %s1523_s6 = smov 32   ;;  %s1524_s9 = smov 96   ;;  %s1977_s2 = inlined_call_operand.vmem [shape: bf16[64,256], index: 2, kind: input, shape index: {}]   ;;  %s1978_s0 = inlined_call_operand.vmem [shape: bf16[8,2,128], index: 0, kind: input, shape index: {}]   ;;  %s1979_s1 = inlined_call_operand.vmem [shape: bf16[8,2,128], index: 1, kind: input, shape index: {}]   ;;  %s1980_s3 = inlined_call_operand.vmem [shape: f32[8,2,32], index: 3, kind: output, shape index: {0}]   ;;  %s1981_s4 = inlined_call_operand.vmem [shape: f32[8,2,32], index: 4, kind: output, shape index: {1}]  }
   0x1   :  { %v1554_v0 = vld [vmem:[%s1977_s2 + $0x4] ss:$8 sps:$4 sm:$0xff]   ;;  %144 = vmatprep.mubr.bf16.mxu0 %v1520_v1  ;;  %55 = vst.msk [vmem:[#allocation2] sm:$0x3] %vm54_vm0, %v1521_v2  ;;  %56 = vst.msk [vmem:[#allocation3] sm:$0x3] %vm54_vm0, %v1521_v2  ;;  %294 = vmatprep.mubr.bf16.mxu1 %v1520_v1  ;;  %v178_v20 = vlaneseq }
   0x2   :  { %v1563_v3 = vld [vmem:[%s1977_s2] ss:$8 sps:$4 sm:$0xff]   ;;  %112 = vmatprep.subr.bf16.mxu0 %v1554_v0  ;;  %v1569_v4 = vld [vmem:[%s1977_s2 + $0x14] ss:$8 sps:$4 sm:$0xff]   ;;  %262 = vmatprep.subr.bf16.mxu1 %v1554_v0  ;;  %v1576_v5 = vld [vmem:[%s1977_s2 + $0x10] ss:$8 sps:$4 sm:$0xff]  }
   0x3   :  { %113 = vmatpush1.bf16.msra.mxu0 %v1563_v3  ;;  %263 = vmatpush1.bf16.msra.mxu1 %v1563_v3  ;;  %v1583_v6 = vld [vmem:[%s1977_s2 + $0x24] ss:$8 sps:$4 sm:$0xff]   ;;  %v1590_v7 = vld [vmem:[%s1977_s2 + $0x20] ss:$8 sps:$4 sm:$0xff]   ;;  %v1597_v8 = vld [vmem:[%s1977_s2 + $0x34] ss:$8 sps:$4 sm:$0xff]  }
   0x4   :  { %114 = vmatprep.subr.bf16.mxu0 %v1569_v4  ;;  %264 = vmatprep.subr.bf16.mxu1 %v1569_v4  ;;  %v1604_v9 = vld [vmem:[%s1977_s2 + $0x30] ss:$8 sps:$4 sm:$0xff]   ;;  %v153_v12 = vld [vmem:[%s1978_s0] sm:$0x1]  ;;  %v1522_v18 = vmov 1983009808  }
   0x5   :  { %v154_v13 = vunpack.c.l.bf16 %v153_v12  ;;  %v176_v19 = vunpack.c.l.s4 %v1522_v18  ;;  %v179_v23 = vshrl.u32 %v178_v20, 7  ;;  %v1339_v30 = vld [vmem:[%s1979_s1 + $0x7] sm:$0x1]  ;;  %s1525_s10 = smov 64   ;;  %vm218_vm2 = vcmask 261120  }
   0x6   :  { %v158_v32 = vunpack.c.l.bf16 %v1339_v30  ;;  %vm248_vm3 = vcmask 254976  }
   0x7   :  { %115 = vmatpush1.bf16.msra.mxu0 %v1576_v5  ;;  %265 = vmatpush1.bf16.msra.mxu1 %v1576_v5  ;;  %v177_v22 = vunpack.c.0.s8 %v176_v19 }
   0x8   :  { %116 = vmatprep.subr.bf16.mxu0 %v1583_v6  ;;  %266 = vmatprep.subr.bf16.mxu1 %v1583_v6  ;;  %v65_v10 = vld [vmem:[#allocation2] sm:$0x3]  ;;  %v66_v25 = vld [vmem:[#allocation3] sm:$0x3] }
   0x9   :  { %v67_v11 = vpack.c.bf16 %v65_v10, %v65_v10  ;;  %v1626_v24 = vsub.s32 %v177_v22, %v179_v23  ;;  %v1344_v10 = vld [vmem:[%s1978_s0 + $0x1] sm:$0x1] }
   0xa   :  { %v305_v12 = vunpack.c.l.bf16 %v1344_v10 }
   0xb   :  { %117 = vmatpush1.bf16.msra.mxu0 %v1590_v7  ;;  %267 = vmatpush1.bf16.msra.mxu1 %v1590_v7  ;;  %v181_v27 = vrot.slane %v66_v25, %v1626_v24 }
   0xc   :  { %118 = vmatprep.subr.bf16.mxu0 %v1597_v8  ;;  %268 = vmatprep.subr.bf16.mxu1 %v1597_v8 }
   0xf   :  { %119 = vmatpush1.bf16.msra.mxu0 %v1604_v9  ;;  %269 = vmatpush1.bf16.msra.mxu1 %v1604_v9 }
  0x10   :  { %411 = vmatprep.subr.bf16.mxu0 %v1554_v0  ;;  %560 = vmatprep.subr.bf16.mxu1 %v1554_v0 }
  0x12   :  { %1338 = vmatmul.mubr.msk.bf16.vlgmr.msra.gmra.mrb[0].mxu0 %vm108_vm1, %v67_v11  ;;  %v1345_v11 = vld [vmem:[%s1979_s1 + $0x6] sm:$0x1] }
  0x13   :  { %412 = vmatpush1.bf16.msra.mxu0 %v1563_v3  ;;  %443 = vmatprep.mubr.bf16.mxu0 %v1520_v1 }
  0x14   :  { %413 = vmatprep.subr.bf16.mxu0 %v1569_v4 }
  0x17   :  { %414 = vmatpush1.bf16.msra.mxu0 %v1576_v5 }
  0x18   :  { %415 = vmatprep.subr.bf16.mxu0 %v1583_v6 }
  0x1b   :  { %416 = vmatpush1.bf16.msra.mxu0 %v1590_v7 }
  0x1c   :  { %417 = vmatprep.subr.bf16.mxu0 %v1597_v8 }
  0x1f   :  { %418 = vmatpush1.bf16.msra.mxu0 %v1604_v9 }
  0x20   :  { %709 = vmatprep.subr.bf16.mxu0 %v1554_v0 }
  0xe5   :  { %v146_v14 = vpop.f32.mrb[0].mxu0 }
  0xe6   :  { %v155_v15 = vadd.f32 %v154_v13, %v146_v14  ;;  %v148_v16 = vpop.f32.mrb[1].mxu0  ;;  %v309_v13 = vunpack.c.l.bf16 %v1345_v11 }
  0xe7   :  { %v150_v17 = vpop.f32.mrb[2].mxu0  ;;  %v159_v33 = vadd.f32 %v158_v32, %v148_v16 }
  0xe8   :  { %1408 = vtanh.f32 %v155_v15  ;;  %v151_v21 = vpop.f32.mrb[3].mxu0  ;;  %v1340_v28 = vmul.f32 -1.442695, %v155_v15 }
  0xe9   :  { %v1341_v38 = vmul.f32 -1.442695, %v159_v33 }
  0xea   :  { %1410 = vpow2.f32 %v1340_v28 }
  0xf2   :  { %v1409_v26 = vpop.eup %1408 }
  0xf3   :  { %187 = vrot.lane.b32.xlu0 %v1409_v26, %s1523_s6 }
  0xf4   :  { %v1411_v29 = vpop.eup %1410 }
  0xf5   :  { %v163_v31 = vadd.f32 1.0, %v1411_v29 }
  0xf7   :  { %182 = vrot.lane.b32.xlu0 %v181_v27, %s1523_s6  ;;  %1412 = vrcp.f32 %v163_v31 }
  0xf8   :  { %1414 = vtanh.f32 %v159_v33 }
  0xf9   :  { %1416 = vpow2.f32 %v1341_v38 }
 0x101   :  { %v1413_v34 = vpop.eup %1412 }
 0x102   :  { %v1415_v37 = vpop.eup %1414  ;;  %v227_v50 = vrot.slane %v1413_v34, %v1626_v24 }
 0x103   :  { %v1417_v39 = vpop.eup %1416 }
 0x104   :  { %v170_v40 = vadd.f32 1.0, %v1417_v39 }
 0x106   :  { %1418 = vrcp.f32 %v170_v40 }
 0x110   :  { %v1419_v46 = vpop.eup %1418 }
 0x111   :  { %v238_v49 = vrot.slane %v1419_v46, %v1626_v24  ;;  %v196_v51 = vmul.f32 %v1419_v46, %v66_v25 }
 0x165   :  { %v188_v35 = vpop.permute.xlu0 %187 }
 0x166   :  { %v190_v36 = vmul.f32 %v1413_v34, %v188_v35 }
 0x168   :  { %192 = vrot.lane.b32.xlu1 %v190_v36, %s1523_s6 }
 0x169   :  { %v183_v41 = vpop.permute.xlu0 %182 }
 0x16a   :  { %v185_v42 = vmul.f32 %v1413_v34, %v183_v41 }
 0x16c   :  { %198 = vrot.lane.b32.xlu1 %v1415_v37, %s1523_s6 }
 0x1da   :  { %v193_v43 = vpop.permute.xlu1 %192 }
 0x1db   :  { %v195_v44 = vadd.f32 %v193_v43, %v185_v42 }
 0x1dd   :  { %v214_v45 = vrot.slane %v195_v44, %v1626_v24 }
 0x1de   :  { %v199_v47 = vpop.permute.xlu1 %198 }
 0x1df   :  { %v201_v48 = vmul.f32 %v1419_v46, %v199_v47  ;;  %215 = vrot.lane.b32.xlu1 %v214_v45, %s1524_s9 }
 0x1e1   :  { %203 = vrot.lane.b32.xlu0 %v201_v48, %s1523_s6 }
 0x1e3   :  { %239 = vrot.lane.b32.xlu1 %v238_v49, %s1524_s9 }
 0x1e5   :  { %228 = vrot.lane.b32.xlu0 %v227_v50, %s1525_s10 }
 0x251   :  { %v216_v54 = vpop.permute.xlu1 %215 }
 0x253   :  { %v204_v52 = vpop.permute.xlu0 %203 }
 0x254   :  { %v206_v53 = vadd.f32 %v204_v52, %v196_v51 }
 0x255   :  { %v240_v59 = vpop.permute.xlu1 %239 }
 0x256   :  { %v219_v55 = vsel %vm218_vm2, %v216_v54, %v206_v53 }
 0x257   :  { %1420 = vtanh.f32 %v219_v55  ;;  %246 = vst.msk [vmem:[#allocation3] sm:$0x3] %vm54_vm0, %v219_v55  ;;  %v229_v56 = vpop.permute.xlu0 %228 }
 0x258   :  { %v242_v61 = vsel %vm218_vm2, %v229_v56, %v240_v59  ;;  %v1351_v56 = vld [vmem:[%s1978_s0 + $0x2] sm:$0x1] }
 0x25e   :  { %v1645_v57 = vld [vmem:[#allocation3] sm:$0x3] }
 0x25f   :  { %v332_v58 = vrot.slane %v1645_v57, %v1626_v24 }
 0x261   :  { %v1421_v60 = vpop.eup %1420  ;;  %333 = vrot.lane.b32.xlu1 %v332_v58, %s1523_s6  ;;  %v454_v58 = vunpack.c.l.bf16 %v1351_v56 }
 0x262   :  { %v1651_v62 = vmul.f32 %v1421_v60, %v242_v61 }
 0x264   :  { %247 = vst.msk [vmem:[#allocation2] sm:$0x3] %vm54_vm0, %v1651_v62 }
 0x265   :  { %249 = vst.msk [vmem:[%s1980_s3] sm:$0x3] %vm248_vm3, %v1651_v62 }
 0x26b   :  { %v256_v63 = vld [vmem:[#allocation2] sm:$0x3] }
 0x26c   :  { %v258_v2 = vpack.c.bf16 %v256_v63, %v256_v63 }
 0x26e   :  { %1343 = vmatmul.mubr.msk.bf16.vlgmr.msra.gmra.mrb[0].mxu1 %vm108_vm1, %v258_v2 }
 0x26f   :  { %561 = vmatpush1.bf16.msra.mxu1 %v1563_v3  ;;  %592 = vmatprep.mubr.bf16.mxu1 %v1520_v1 }
 0x270   :  { %562 = vmatprep.subr.bf16.mxu1 %v1569_v4 }
 0x273   :  { %563 = vmatpush1.bf16.msra.mxu1 %v1576_v5 }
 0x274   :  { %564 = vmatprep.subr.bf16.mxu1 %v1583_v6 }
 0x277   :  { %565 = vmatpush1.bf16.msra.mxu1 %v1590_v7 }
 0x278   :  { %566 = vmatprep.subr.bf16.mxu1 %v1597_v8 }
 0x27b   :  { %567 = vmatpush1.bf16.msra.mxu1 %v1604_v9 }
 0x27c   :  { %858 = vmatprep.subr.bf16.mxu1 %v1554_v0 }
 0x2d3   :  { %v334_v29 = vpop.permute.xlu1 %333 }
 0x341   :  { %v296_v14 = vpop.f32.mrb[0].mxu1 }
 0x342   :  { %v306_v15 = vadd.f32 %v305_v12, %v296_v14  ;;  %v298_v16 = vpop.f32.mrb[1].mxu1 }
 0x343   :  { %v310_v17 = vadd.f32 %v309_v13, %v298_v16  ;;  %v300_v18 = vpop.f32.mrb[2].mxu1 }
 0x344   :  { %1422 = vtanh.f32 %v306_v15  ;;  %v301_v19 = vpop.f32.mrb[3].mxu1  ;;  %v1346_v22 = vmul.f32 -1.442695, %v306_v15 }
 0x345   :  { %1424 = vtanh.f32 %v310_v17  ;;  %v1347_v23 = vmul.f32 -1.442695, %v310_v17 }
 0x346   :  { %1426 = vpow2.f32 %v1346_v22 }
 0x347   :  { %1428 = vpow2.f32 %v1347_v23 }
 0x34e   :  { %v1423_v20 = vpop.eup %1422 }
 0x34f   :  { %v1425_v21 = vpop.eup %1424  ;;  %338 = vrot.lane.b32.xlu0 %v1423_v20, %s1523_s6 }
 0x350   :  { %349 = vrot.lane.b32.xlu1 %v1425_v21, %s1523_s6  ;;  %v1427_v25 = vpop.eup %1426 }
 0x351   :  { %v314_v26 = vadd.f32 1.0, %v1427_v25  ;;  %v1429_v27 = vpop.eup %1428 }
 0x352   :  { %v321_v28 = vadd.f32 1.0, %v1429_v27 }
 0x353   :  { %1430 = vrcp.f32 %v314_v26 }
 0x354   :  { %1432 = vrcp.f32 %v321_v28 }
 0x35d   :  { %v1431_v30 = vpop.eup %1430 }
 0x35e   :  { %v1433_v34 = vpop.eup %1432  ;;  %v377_v36 = vrot.slane %v1431_v30, %v1626_v24  ;;  %v336_v37 = vmul.f32 %v1431_v30, %v334_v29 }
 0x35f   :  { %v388_v41 = vrot.slane %v1433_v34, %v1626_v24  ;;  %v347_v43 = vmul.f32 %v1433_v34, %v1645_v57  ;;  %v1352_v57 = vld [vmem:[%s1979_s1 + $0x5] sm:$0x1] }
 0x360   :  { %v458_v59 = vunpack.c.l.bf16 %v1352_v57 }
 0x3c1   :  { %v339_v31 = vpop.permute.xlu0 %338 }
 0x3c2   :  { %v341_v32 = vmul.f32 %v1431_v30, %v339_v31  ;;  %v350_v33 = vpop.permute.xlu1 %349 }
 0x3c3   :  { %v352_v35 = vmul.f32 %v1433_v34, %v350_v33 }
 0x3c4   :  { %343 = vrot.lane.b32.xlu0 %v341_v32, %s1523_s6 }
 0x3c8   :  { %354 = vrot.lane.b32.xlu0 %v352_v35, %s1523_s6 }
 0x3cc   :  { %378 = vrot.lane.b32.xlu0 %v377_v36, %s1525_s10 }
 0x436   :  { %v344_v38 = vpop.permute.xlu0 %343 }
 0x437   :  { %v346_v39 = vadd.f32 %v344_v38, %v336_v37 }
 0x439   :  { %v365_v40 = vrot.slane %v346_v39, %v1626_v24 }
 0x43a   :  { %v355_v42 = vpop.permute.xlu0 %354 }
 0x43b   :  { %366 = vrot.lane.b32.xlu1 %v365_v40, %s1524_s9  ;;  %v357_v44 = vadd.f32 %v355_v42, %v347_v43 }
 0x43e   :  { %v379_v50 = vpop.permute.xlu0 %378 }
 0x43f   :  { %389 = vrot.lane.b32.xlu1 %v388_v41, %s1524_s9 }
 0x4ad   :  { %v367_v45 = vpop.permute.xlu1 %366 }
 0x4ae   :  { %v369_v46 = vsel %vm218_vm2, %v367_v45, %v357_v44 }
 0x4af   :  { %1434 = vtanh.f32 %v369_v46  ;;  %395 = vst.msk [vmem:[#allocation3] sm:$0x3] %vm54_vm0, %v369_v46 }
 0x4b1   :  { %v390_v47 = vpop.permute.xlu1 %389 }
 0x4b2   :  { %v392_v52 = vsel %vm218_vm2, %v379_v50, %v390_v47 }
 0x4b6   :  { %v1689_v48 = vld [vmem:[#allocation3] sm:$0x3] }
 0x4b7   :  { %v481_v49 = vrot.slane %v1689_v48, %v1626_v24 }
 0x4b9   :  { %v1435_v51 = vpop.eup %1434  ;;  %482 = vrot.lane.b32.xlu1 %v481_v49, %s1523_s6  ;;  %v1359_v49 = vld [vmem:[%s1979_s1 + $0x4] sm:$0x1] }
 0x4ba   :  { %v1695_v53 = vmul.f32 %v1435_v51, %v392_v52  ;;  %v607_v51 = vunpack.c.l.bf16 %v1359_v49 }
 0x4bc   :  { %396 = vst.msk [vmem:[#allocation2] sm:$0x3] %vm54_vm0, %v1695_v53 }
 0x4bd   :  { %1348 = vst.msk [vmem:[%s1980_s3 + $0x2] sm:$0x3] %vm248_vm3, %v1695_v53 }
 0x4c3   :  { %v405_v54 = vld [vmem:[#allocation2] sm:$0x3] }
 0x4c4   :  { %v407_v55 = vpack.c.bf16 %v405_v54, %v405_v54 }
 0x4c6   :  { %1350 = vmatmul.mubr.msk.bf16.vlgmr.msra.gmra.mrb[4].mxu0 %vm108_vm1, %v407_v55 }
 0x4c7   :  { %710 = vmatpush1.bf16.msra.mxu0 %v1563_v3  ;;  %741 = vmatprep.mubr.bf16.mxu0 %v1520_v1 }
 0x4c8   :  { %711 = vmatprep.subr.bf16.mxu0 %v1569_v4 }
 0x4cb   :  { %712 = vmatpush1.bf16.msra.mxu0 %v1576_v5 }
 0x4cc   :  { %713 = vmatprep.subr.bf16.mxu0 %v1583_v6 }
 0x4cf   :  { %714 = vmatpush1.bf16.msra.mxu0 %v1590_v7 }
 0x4d0   :  { %715 = vmatprep.subr.bf16.mxu0 %v1597_v8 }
 0x4d3   :  { %716 = vmatpush1.bf16.msra.mxu0 %v1604_v9 }
 0x4d4   :  { %1007 = vmatprep.subr.bf16.mxu0 %v1554_v0 }
 0x52b   :  { %v483_v20 = vpop.permute.xlu1 %482 }
 0x599   :  { %v445_v60 = vpop.f32.mrb[4].mxu0 }
 0x59a   :  { %v455_v61 = vadd.f32 %v454_v58, %v445_v60  ;;  %v447_v63 = vpop.f32.mrb[5].mxu0 }
 0x59b   :  { %v459_v2 = vadd.f32 %v458_v59, %v447_v63  ;;  %v449_v10 = vpop.f32.mrb[6].mxu0 }
 0x59c   :  { %1436 = vtanh.f32 %v455_v61  ;;  %v450_v11 = vpop.f32.mrb[7].mxu0  ;;  %v1353_v14 = vmul.f32 -1.442695, %v455_v61 }
 0x59d   :  { %1438 = vtanh.f32 %v459_v2  ;;  %v1354_v15 = vmul.f32 -1.442695, %v459_v2 }
 0x59e   :  { %1440 = vpow2.f32 %v1353_v14 }
 0x59f   :  { %1442 = vpow2.f32 %v1354_v15 }
 0x5a6   :  { %v1437_v12 = vpop.eup %1436 }
 0x5a7   :  { %v1439_v13 = vpop.eup %1438  ;;  %487 = vrot.lane.b32.xlu0 %v1437_v12, %s1523_s6 }
 0x5a8   :  { %498 = vrot.lane.b32.xlu1 %v1439_v13, %s1523_s6  ;;  %v1441_v16 = vpop.eup %1440 }
 0x5a9   :  { %v463_v17 = vadd.f32 1.0, %v1441_v16  ;;  %v1443_v18 = vpop.eup %1442 }
 0x5aa   :  { %v470_v19 = vadd.f32 1.0, %v1443_v18 }
 0x5ab   :  { %1444 = vrcp.f32 %v463_v17 }
 0x5ac   :  { %1446 = vrcp.f32 %v470_v19 }
 0x5b5   :  { %v1445_v21 = vpop.eup %1444 }
 0x5b6   :  { %v1447_v26 = vpop.eup %1446  ;;  %v526_v28 = vrot.slane %v1445_v21, %v1626_v24  ;;  %v485_v29 = vmul.f32 %v1445_v21, %v483_v20 }
 0x5b7   :  { %v537_v33 = vrot.slane %v1447_v26, %v1626_v24  ;;  %v496_v35 = vmul.f32 %v1447_v26, %v1689_v48  ;;  %v1358_v48 = vld [vmem:[%s1978_s0 + $0x3] sm:$0x1] }
 0x5b8   :  { %v603_v50 = vunpack.c.l.bf16 %v1358_v48 }
 0x619   :  { %v488_v22 = vpop.permute.xlu0 %487 }
 0x61a   :  { %v490_v23 = vmul.f32 %v1445_v21, %v488_v22  ;;  %v499_v25 = vpop.permute.xlu1 %498 }
 0x61b   :  { %v501_v27 = vmul.f32 %v1447_v26, %v499_v25 }
 0x61c   :  { %492 = vrot.lane.b32.xlu0 %v490_v23, %s1523_s6 }
 0x620   :  { %503 = vrot.lane.b32.xlu0 %v501_v27, %s1523_s6 }
 0x624   :  { %527 = vrot.lane.b32.xlu0 %v526_v28, %s1525_s10 }
 0x68e   :  { %v493_v30 = vpop.permute.xlu0 %492 }
 0x68f   :  { %v495_v31 = vadd.f32 %v493_v30, %v485_v29 }
 0x691   :  { %v514_v32 = vrot.slane %v495_v31, %v1626_v24 }
 0x692   :  { %v504_v34 = vpop.permute.xlu0 %503 }
 0x693   :  { %515 = vrot.lane.b32.xlu1 %v514_v32, %s1524_s9  ;;  %v506_v36 = vadd.f32 %v504_v34, %v496_v35 }
 0x696   :  { %v528_v42 = vpop.permute.xlu0 %527 }
 0x697   :  { %538 = vrot.lane.b32.xlu1 %v537_v33, %s1524_s9 }
 0x705   :  { %v516_v37 = vpop.permute.xlu1 %515 }
 0x706   :  { %v518_v38 = vsel %vm218_vm2, %v516_v37, %v506_v36 }
 0x707   :  { %1448 = vtanh.f32 %v518_v38  ;;  %544 = vst.msk [vmem:[#allocation3] sm:$0x3] %vm54_vm0, %v518_v38 }
 0x709   :  { %v539_v39 = vpop.permute.xlu1 %538 }
 0x70a   :  { %v541_v44 = vsel %vm218_vm2, %v528_v42, %v539_v39 }
 0x70e   :  { %v1733_v40 = vld [vmem:[#allocation3] sm:$0x3] }
 0x70f   :  { %v630_v41 = vrot.slane %v1733_v40, %v1626_v24 }
 0x711   :  { %v1449_v43 = vpop.eup %1448  ;;  %631 = vrot.lane.b32.xlu1 %v630_v41, %s1523_s6  ;;  %v1366_v41 = vld [vmem:[%s1979_s1 + $0x3] sm:$0x1] }
 0x712   :  { %v1739_v45 = vmul.f32 %v1449_v43, %v541_v44  ;;  %v756_v43 = vunpack.c.l.bf16 %v1366_v41 }
 0x714   :  { %545 = vst.msk [vmem:[#allocation2] sm:$0x3] %vm54_vm0, %v1739_v45 }
 0x715   :  { %1355 = vst.msk [vmem:[%s1980_s3 + $0x4] sm:$0x3] %vm248_vm3, %v1739_v45 }
 0x71b   :  { %v554_v46 = vld [vmem:[#allocation2] sm:$0x3] }
 0x71c   :  { %v556_v47 = vpack.c.bf16 %v554_v46, %v554_v46 }
 0x71e   :  { %1357 = vmatmul.mubr.msk.bf16.vlgmr.msra.gmra.mrb[4].mxu1 %vm108_vm1, %v556_v47 }
 0x71f   :  { %859 = vmatpush1.bf16.msra.mxu1 %v1563_v3  ;;  %890 = vmatprep.mubr.bf16.mxu1 %v1520_v1 }
 0x720   :  { %860 = vmatprep.subr.bf16.mxu1 %v1569_v4 }
 0x723   :  { %861 = vmatpush1.bf16.msra.mxu1 %v1576_v5 }
 0x724   :  { %862 = vmatprep.subr.bf16.mxu1 %v1583_v6 }
 0x727   :  { %863 = vmatpush1.bf16.msra.mxu1 %v1590_v7 }
 0x728   :  { %864 = vmatprep.subr.bf16.mxu1 %v1597_v8 }
 0x72b   :  { %865 = vmatpush1.bf16.msra.mxu1 %v1604_v9 }
 0x72c   :  { %1156 = vmatprep.subr.bf16.mxu1 %v1554_v0 }
 0x783   :  { %v632_v12 = vpop.permute.xlu1 %631 }
 0x7f1   :  { %v594_v52 = vpop.f32.mrb[4].mxu1 }
 0x7f2   :  { %v604_v54 = vadd.f32 %v603_v50, %v594_v52  ;;  %v596_v55 = vpop.f32.mrb[5].mxu1 }
 0x7f3   :  { %v608_v56 = vadd.f32 %v607_v51, %v596_v55  ;;  %v598_v57 = vpop.f32.mrb[6].mxu1 }
 0x7f4   :  { %1450 = vtanh.f32 %v604_v54  ;;  %v599_v58 = vpop.f32.mrb[7].mxu1  ;;  %v1360_v60 = vmul.f32 -1.442695, %v604_v54 }
 0x7f5   :  { %1452 = vtanh.f32 %v608_v56  ;;  %v1361_v61 = vmul.f32 -1.442695, %v608_v56 }
 0x7f6   :  { %1454 = vpow2.f32 %v1360_v60 }
 0x7f7   :  { %1456 = vpow2.f32 %v1361_v61 }
 0x7fe   :  { %v1451_v59 = vpop.eup %1450 }
 0x7ff   :  { %v1453_v0 = vpop.eup %1452  ;;  %636 = vrot.lane.b32.xlu0 %v1451_v59, %s1523_s6 }
 0x800   :  { %647 = vrot.lane.b32.xlu1 %v1453_v0, %s1523_s6  ;;  %v1455_v63 = vpop.eup %1454 }
 0x801   :  { %v612_v2 = vadd.f32 1.0, %v1455_v63  ;;  %v1457_v10 = vpop.eup %1456 }
 0x802   :  { %v619_v11 = vadd.f32 1.0, %v1457_v10 }
 0x803   :  { %1458 = vrcp.f32 %v612_v2 }
 0x804   :  { %1460 = vrcp.f32 %v619_v11 }
 0x80d   :  { %v1459_v13 = vpop.eup %1458 }
 0x80e   :  { %v1461_v17 = vpop.eup %1460  ;;  %v675_v19 = vrot.slane %v1459_v13, %v1626_v24  ;;  %v634_v20 = vmul.f32 %v1459_v13, %v632_v12 }
 0x80f   :  { %v686_v25 = vrot.slane %v1461_v17, %v1626_v24  ;;  %v645_v27 = vmul.f32 %v1461_v17, %v1733_v40  ;;  %v1365_v40 = vld [vmem:[%s1978_s0 + $0x4] sm:$0x1] }
 0x810   :  { %v752_v42 = vunpack.c.l.bf16 %v1365_v40 }
 0x871   :  { %v637_v14 = vpop.permute.xlu0 %636 }
 0x872   :  { %v639_v15 = vmul.f32 %v1459_v13, %v637_v14  ;;  %v648_v16 = vpop.permute.xlu1 %647 }
 0x873   :  { %v650_v18 = vmul.f32 %v1461_v17, %v648_v16 }
 0x874   :  { %641 = vrot.lane.b32.xlu0 %v639_v15, %s1523_s6 }
 0x878   :  { %652 = vrot.lane.b32.xlu0 %v650_v18, %s1523_s6 }
 0x87c   :  { %676 = vrot.lane.b32.xlu0 %v675_v19, %s1525_s10 }
 0x8e6   :  { %v642_v21 = vpop.permute.xlu0 %641 }
 0x8e7   :  { %v644_v22 = vadd.f32 %v642_v21, %v634_v20 }
 0x8e9   :  { %v663_v23 = vrot.slane %v644_v22, %v1626_v24 }
 0x8ea   :  { %v653_v26 = vpop.permute.xlu0 %652 }
 0x8eb   :  { %664 = vrot.lane.b32.xlu1 %v663_v23, %s1524_s9  ;;  %v655_v28 = vadd.f32 %v653_v26, %v645_v27 }
 0x8ee   :  { %v677_v34 = vpop.permute.xlu0 %676 }
 0x8ef   :  { %687 = vrot.lane.b32.xlu1 %v686_v25, %s1524_s9 }
 0x95d   :  { %v665_v29 = vpop.permute.xlu1 %664 }
 0x95e   :  { %v667_v30 = vsel %vm218_vm2, %v665_v29, %v655_v28 }
 0x95f   :  { %1462 = vtanh.f32 %v667_v30  ;;  %693 = vst.msk [vmem:[#allocation3] sm:$0x3] %vm54_vm0, %v667_v30 }
 0x961   :  { %v688_v31 = vpop.permute.xlu1 %687 }
 0x962   :  { %v690_v36 = vsel %vm218_vm2, %v677_v34, %v688_v31 }
 0x966   :  { %v1777_v32 = vld [vmem:[#allocation3] sm:$0x3] }
 0x967   :  { %v779_v33 = vrot.slane %v1777_v32, %v1626_v24 }
 0x969   :  { %v1463_v35 = vpop.eup %1462  ;;  %780 = vrot.lane.b32.xlu1 %v779_v33, %s1523_s6  ;;  %v1372_v33 = vld [vmem:[%s1978_s0 + $0x5] sm:$0x1] }
 0x96a   :  { %v1783_v37 = vmul.f32 %v1463_v35, %v690_v36 }
 0x96c   :  { %694 = vst.msk [vmem:[#allocation2] sm:$0x3] %vm54_vm0, %v1783_v37 }
 0x96d   :  { %1362 = vst.msk [vmem:[%s1980_s3 + $0x6] sm:$0x3] %vm248_vm3, %v1783_v37 }
 0x973   :  { %v703_v38 = vld [vmem:[#allocation2] sm:$0x3] }
 0x974   :  { %v705_v39 = vpack.c.bf16 %v703_v38, %v703_v38 }
 0x976   :  { %1364 = vmatmul.mubr.msk.bf16.vlgmr.msra.gmra.mrb[8].mxu0 %vm108_vm1, %v705_v39 }
 0x977   :  { %1008 = vmatpush1.bf16.msra.mxu0 %v1563_v3  ;;  %1039 = vmatprep.mubr.bf16.mxu0 %v1520_v1 }
 0x978   :  { %1009 = vmatprep.subr.bf16.mxu0 %v1569_v4 }
 0x97b   :  { %1010 = vmatpush1.bf16.msra.mxu0 %v1576_v5 }
 0x97c   :  { %1011 = vmatprep.subr.bf16.mxu0 %v1583_v6 }
 0x97f   :  { %1012 = vmatpush1.bf16.msra.mxu0 %v1590_v7 }
 0x980   :  { %1013 = vmatprep.subr.bf16.mxu0 %v1597_v8 }
 0x983   :  { %1014 = vmatpush1.bf16.msra.mxu0 %v1604_v9 }
 0x9db   :  { %v781_v0 = vpop.permute.xlu1 %780 }
 0xa49   :  { %v743_v44 = vpop.f32.mrb[8].mxu0 }
 0xa4a   :  { %v753_v46 = vadd.f32 %v752_v42, %v743_v44  ;;  %v745_v47 = vpop.f32.mrb[9].mxu0 }
 0xa4b   :  { %v757_v48 = vadd.f32 %v756_v43, %v745_v47  ;;  %v747_v49 = vpop.f32.mrb[10].mxu0 }
 0xa4c   :  { %1464 = vtanh.f32 %v753_v46  ;;  %v748_v50 = vpop.f32.mrb[11].mxu0  ;;  %v1367_v54 = vmul.f32 -1.442695, %v753_v46 }
 0xa4d   :  { %1466 = vtanh.f32 %v757_v48  ;;  %v1368_v55 = vmul.f32 -1.442695, %v757_v48 }
 0xa4e   :  { %1468 = vpow2.f32 %v1367_v54 }
 0xa4f   :  { %1470 = vpow2.f32 %v1368_v55 }
 0xa56   :  { %v1465_v51 = vpop.eup %1464 }
 0xa57   :  { %v1467_v52 = vpop.eup %1466  ;;  %785 = vrot.lane.b32.xlu0 %v1465_v51, %s1523_s6 }
 0xa58   :  { %796 = vrot.lane.b32.xlu1 %v1467_v52, %s1523_s6  ;;  %v1469_v56 = vpop.eup %1468 }
 0xa59   :  { %v761_v57 = vadd.f32 1.0, %v1469_v56  ;;  %v1471_v58 = vpop.eup %1470 }
 0xa5a   :  { %v768_v59 = vadd.f32 1.0, %v1471_v58 }
 0xa5b   :  { %1472 = vrcp.f32 %v761_v57 }
 0xa5c   :  { %1474 = vrcp.f32 %v768_v59 }
 0xa65   :  { %v1473_v60 = vpop.eup %1472 }
 0xa66   :  { %v1475_v10 = vpop.eup %1474  ;;  %v824_v12 = vrot.slane %v1473_v60, %v1626_v24  ;;  %v783_v13 = vmul.f32 %v1473_v60, %v781_v0 }
 0xa67   :  { %v835_v17 = vrot.slane %v1475_v10, %v1626_v24  ;;  %v794_v19 = vmul.f32 %v1475_v10, %v1777_v32 }
 0xac9   :  { %v786_v61 = vpop.permute.xlu0 %785 }
 0xaca   :  { %v788_v63 = vmul.f32 %v1473_v60, %v786_v61  ;;  %v797_v2 = vpop.permute.xlu1 %796 }
 0xacb   :  { %v799_v11 = vmul.f32 %v1475_v10, %v797_v2 }
 0xacc   :  { %790 = vrot.lane.b32.xlu0 %v788_v63, %s1523_s6 }
 0xad0   :  { %801 = vrot.lane.b32.xlu0 %v799_v11, %s1523_s6 }
 0xad4   :  { %825 = vrot.lane.b32.xlu0 %v824_v12, %s1525_s10 }
 0xb3e   :  { %v791_v14 = vpop.permute.xlu0 %790 }
 0xb3f   :  { %v793_v15 = vadd.f32 %v791_v14, %v783_v13 }
 0xb41   :  { %v812_v16 = vrot.slane %v793_v15, %v1626_v24 }
 0xb42   :  { %v802_v18 = vpop.permute.xlu0 %801 }
 0xb43   :  { %813 = vrot.lane.b32.xlu1 %v812_v16, %s1524_s9  ;;  %v804_v20 = vadd.f32 %v802_v18, %v794_v19  ;;  %v1379_v18 = vld [vmem:[%s1978_s0 + $0x6] sm:$0x1]  ;;  %v1380_v19 = vld [vmem:[%s1979_s1 + $0x1] sm:$0x1] }
 0xb46   :  { %v826_v27 = vpop.permute.xlu0 %825 }
 0xb47   :  { %836 = vrot.lane.b32.xlu1 %v835_v17, %s1524_s9 }
 0xbb5   :  { %v814_v21 = vpop.permute.xlu1 %813 }
 0xbb6   :  { %v816_v22 = vsel %vm218_vm2, %v814_v21, %v804_v20  ;;  %v1050_v20 = vunpack.c.l.bf16 %v1379_v18  ;;  %v1054_v21 = vunpack.c.l.bf16 %v1380_v19 }
 0xbb7   :  { %1476 = vtanh.f32 %v816_v22  ;;  %842 = vst.msk [vmem:[#allocation3] sm:$0x3] %vm54_vm0, %v816_v22 }
 0xbb9   :  { %v837_v23 = vpop.permute.xlu1 %836 }
 0xbba   :  { %v839_v29 = vsel %vm218_vm2, %v826_v27, %v837_v23 }
 0xbbe   :  { %v1820_v25 = vld [vmem:[#allocation3] sm:$0x3] }
 0xbbf   :  { %v928_v26 = vrot.slane %v1820_v25, %v1626_v24 }
 0xbc1   :  { %v1477_v28 = vpop.eup %1476  ;;  %929 = vrot.lane.b32.xlu1 %v928_v26, %s1523_s6 }
 0xbc2   :  { %v1826_v30 = vmul.f32 %v1477_v28, %v839_v29 }
 0xbc4   :  { %843 = vst.msk [vmem:[#allocation2] sm:$0x3] %vm54_vm0, %v1826_v30 }
 0xbc5   :  { %1369 = vst.msk [vmem:[%s1980_s3 + $0x8] sm:$0x3] %vm248_vm3, %v1826_v30 }
 0xbcb   :  { %v852_v31 = vld [vmem:[#allocation2] sm:$0x3] }
 0xbcc   :  { %v854_v32 = vpack.c.bf16 %v852_v31, %v852_v31 }
 0xbce   :  { %1371 = vmatmul.mubr.msk.bf16.vlgmr.msra.gmra.mrb[8].mxu1 %vm108_vm1, %v854_v32 }
 0xbcf   :  { %1157 = vmatpush1.bf16.msra.mxu1 %v1563_v3  ;;  %1188 = vmatprep.mubr.bf16.mxu1 %v1520_v1  ;;  %v1373_v1 = vld [vmem:[%s1979_s1 + $0x2] sm:$0x1]  ;;  %v901_v3 = vunpack.c.l.bf16 %v1372_v33 }
 0xbd0   :  { %1158 = vmatprep.subr.bf16.mxu1 %v1569_v4  ;;  %v905_v4 = vunpack.c.l.bf16 %v1373_v1 }
 0xbd3   :  { %1159 = vmatpush1.bf16.msra.mxu1 %v1576_v5 }
 0xbd4   :  { %1160 = vmatprep.subr.bf16.mxu1 %v1583_v6 }
 0xbd7   :  { %1161 = vmatpush1.bf16.msra.mxu1 %v1590_v7 }
 0xbd8   :  { %1162 = vmatprep.subr.bf16.mxu1 %v1597_v8 }
 0xbdb   :  { %1163 = vmatpush1.bf16.msra.mxu1 %v1604_v9 }
 0xc33   :  { %v930_v44 = vpop.permute.xlu1 %929 }
 0xca1   :  { %v892_v34 = vpop.f32.mrb[8].mxu1 }
 0xca2   :  { %v902_v5 = vadd.f32 %v901_v3, %v892_v34  ;;  %v894_v35 = vpop.f32.mrb[9].mxu1 }
 0xca3   :  { %v906_v6 = vadd.f32 %v905_v4, %v894_v35  ;;  %v896_v36 = vpop.f32.mrb[10].mxu1 }
 0xca4   :  { %1478 = vtanh.f32 %v902_v5  ;;  %v897_v7 = vpop.f32.mrb[11].mxu1  ;;  %v1374_v38 = vmul.f32 -1.442695, %v902_v5 }
 0xca5   :  { %1480 = vtanh.f32 %v906_v6  ;;  %v1375_v39 = vmul.f32 -1.442695, %v906_v6 }
 0xca6   :  { %1482 = vpow2.f32 %v1374_v38 }
 0xca7   :  { %1484 = vpow2.f32 %v1375_v39 }
 0xcae   :  { %v1479_v8 = vpop.eup %1478 }
 0xcaf   :  { %v1481_v9 = vpop.eup %1480  ;;  %934 = vrot.lane.b32.xlu0 %v1479_v8, %s1523_s6 }
 0xcb0   :  { %945 = vrot.lane.b32.xlu1 %v1481_v9, %s1523_s6  ;;  %v1483_v40 = vpop.eup %1482 }
 0xcb1   :  { %v910_v41 = vadd.f32 1.0, %v1483_v40  ;;  %v1485_v42 = vpop.eup %1484 }
 0xcb2   :  { %v917_v43 = vadd.f32 1.0, %v1485_v42 }
 0xcb3   :  { %1486 = vrcp.f32 %v910_v41 }
 0xcb4   :  { %1488 = vrcp.f32 %v917_v43 }
 0xcbd   :  { %v1487_v46 = vpop.eup %1486 }
 0xcbe   :  { %v1489_v50 = vpop.eup %1488  ;;  %v973_v52 = vrot.slane %v1487_v46, %v1626_v24  ;;  %v932_v54 = vmul.f32 %v1487_v46, %v930_v44 }
 0xcbf   :  { %v984_v58 = vrot.slane %v1489_v50, %v1626_v24  ;;  %v943_v0 = vmul.f32 %v1489_v50, %v1820_v25 }
 0xd21   :  { %v935_v47 = vpop.permute.xlu0 %934 }
 0xd22   :  { %v937_v48 = vmul.f32 %v1487_v46, %v935_v47  ;;  %v946_v49 = vpop.permute.xlu1 %945 }
 0xd23   :  { %v948_v51 = vmul.f32 %v1489_v50, %v946_v49 }
 0xd24   :  { %939 = vrot.lane.b32.xlu0 %v937_v48, %s1523_s6 }
 0xd28   :  { %950 = vrot.lane.b32.xlu0 %v948_v51, %s1523_s6 }
 0xd2c   :  { %974 = vrot.lane.b32.xlu0 %v973_v52, %s1525_s10 }
 0xd96   :  { %v940_v55 = vpop.permute.xlu0 %939 }
 0xd97   :  { %v942_v56 = vadd.f32 %v940_v55, %v932_v54 }
 0xd99   :  { %v961_v57 = vrot.slane %v942_v56, %v1626_v24 }
 0xd9a   :  { %v951_v59 = vpop.permute.xlu0 %950 }
 0xd9b   :  { %962 = vrot.lane.b32.xlu1 %v961_v57, %s1524_s9  ;;  %v953_v60 = vadd.f32 %v951_v59, %v943_v0  ;;  %v1386_v0 = vld [vmem:[%s1978_s0 + $0x7] sm:$0x1] }
 0xd9e   :  { %v975_v12 = vpop.permute.xlu0 %974 }
 0xd9f   :  { %985 = vrot.lane.b32.xlu1 %v984_v58, %s1524_s9 }
 0xe0d   :  { %v963_v61 = vpop.permute.xlu1 %962 }
 0xe0e   :  { %v965_v63 = vsel %vm218_vm2, %v963_v61, %v953_v60  ;;  %v1201_v60 = vld [vmem:[%s1979_s1] sm:$0x1]  ;;  %v1199_v61 = vunpack.c.l.bf16 %v1386_v0 }
 0xe0f   :  { %1490 = vtanh.f32 %v965_v63  ;;  %991 = vst.msk [vmem:[#allocation3] sm:$0x3] %vm54_vm0, %v965_v63  ;;  %v1202_v63 = vunpack.c.l.bf16 %v1201_v60 }
 0xe11   :  { %v986_v2 = vpop.permute.xlu1 %985 }
 0xe12   :  { %v988_v14 = vsel %vm218_vm2, %v975_v12, %v986_v2 }
 0xe16   :  { %v1002_v10 = vld [vmem:[#allocation3] sm:$0x3] }
 0xe17   :  { %v1077_v11 = vrot.slane %v1002_v10, %v1626_v24 }
 0xe19   :  { %v1491_v13 = vpop.eup %1490  ;;  %1078 = vrot.lane.b32.xlu1 %v1077_v11, %s1523_s6 }
 0xe1a   :  { %v1866_v15 = vmul.f32 %v1491_v13, %v988_v14 }
 0xe1c   :  { %992 = vst.msk [vmem:[#allocation2] sm:$0x3] %vm54_vm0, %v1866_v15 }
 0xe1d   :  { %1376 = vst.msk [vmem:[%s1980_s3 + $0xa] sm:$0x3] %vm248_vm3, %v1866_v15 }
 0xe23   :  { %v1001_v16 = vld [vmem:[#allocation2] sm:$0x3] }
 0xe24   :  { %v1003_v17 = vpack.c.bf16 %v1001_v16, %v1001_v16 }
 0xe26   :  { %1378 = vmatmul.mubr.msk.bf16.vlgmr.msra.gmra.mrb[12].mxu0 %vm108_vm1, %v1003_v17 }
 0xe8b   :  { %v1079_v5 = vpop.permute.xlu1 %1078 }
 0xef9   :  { %v1041_v22 = vpop.f32.mrb[12].mxu0 }
 0xefa   :  { %v1051_v23 = vadd.f32 %v1050_v20, %v1041_v22  ;;  %v1043_v25 = vpop.f32.mrb[13].mxu0 }
 0xefb   :  { %v1055_v26 = vadd.f32 %v1054_v21, %v1043_v25  ;;  %v1045_v27 = vpop.f32.mrb[14].mxu0 }
 0xefc   :  { %1492 = vtanh.f32 %v1051_v23  ;;  %v1046_v28 = vpop.f32.mrb[15].mxu0  ;;  %v1381_v32 = vmul.f32 -1.442695, %v1051_v23 }
 0xefd   :  { %1494 = vtanh.f32 %v1055_v26  ;;  %v1382_v33 = vmul.f32 -1.442695, %v1055_v26 }
 0xefe   :  { %1496 = vpow2.f32 %v1381_v32 }
 0xeff   :  { %1498 = vpow2.f32 %v1382_v33 }
 0xf06   :  { %v1493_v29 = vpop.eup %1492 }
 0xf07   :  { %v1495_v31 = vpop.eup %1494  ;;  %1083 = vrot.lane.b32.xlu0 %v1493_v29, %s1523_s6 }
 0xf08   :  { %1094 = vrot.lane.b32.xlu1 %v1495_v31, %s1523_s6  ;;  %v1497_v1 = vpop.eup %1496 }
 0xf09   :  { %v1059_v3 = vadd.f32 1.0, %v1497_v1  ;;  %v1499_v4 = vpop.eup %1498 }
 0xf0a   :  { %v1066_v34 = vadd.f32 1.0, %v1499_v4 }
 0xf0b   :  { %1500 = vrcp.f32 %v1059_v3 }
 0xf0c   :  { %1502 = vrcp.f32 %v1066_v34 }
 0xf15   :  { %v1501_v35 = vpop.eup %1500 }
 0xf16   :  { %v1503_v8 = vpop.eup %1502  ;;  %v1122_v38 = vrot.slane %v1501_v35, %v1626_v24  ;;  %v1081_v39 = vmul.f32 %v1501_v35, %v1079_v5 }
 0xf17   :  { %v1133_v43 = vrot.slane %v1503_v8, %v1626_v24  ;;  %v1092_v46 = vmul.f32 %v1503_v8, %v1002_v10 }
 0xf79   :  { %v1084_v6 = vpop.permute.xlu0 %1083 }
 0xf7a   :  { %v1086_v36 = vmul.f32 %v1501_v35, %v1084_v6  ;;  %v1095_v7 = vpop.permute.xlu1 %1094 }
 0xf7b   :  { %v1097_v9 = vmul.f32 %v1503_v8, %v1095_v7 }
 0xf7c   :  { %1088 = vrot.lane.b32.xlu0 %v1086_v36, %s1523_s6 }
 0xf80   :  { %1099 = vrot.lane.b32.xlu0 %v1097_v9, %s1523_s6 }
 0xf84   :  { %1123 = vrot.lane.b32.xlu0 %v1122_v38, %s1525_s10 }
 0xfee   :  { %v1089_v40 = vpop.permute.xlu0 %1088 }
 0xfef   :  { %v1091_v41 = vadd.f32 %v1089_v40, %v1081_v39 }
 0xff1   :  { %v1110_v42 = vrot.slane %v1091_v41, %v1626_v24 }
 0xff2   :  { %v1100_v44 = vpop.permute.xlu0 %1099 }
 0xff3   :  { %1111 = vrot.lane.b32.xlu1 %v1110_v42, %s1524_s9  ;;  %v1102_v47 = vadd.f32 %v1100_v44, %v1092_v46 }
 0xff6   :  { %v1124_v54 = vpop.permute.xlu0 %1123 }
 0xff7   :  { %1134 = vrot.lane.b32.xlu1 %v1133_v43, %s1524_s9 }
0x1065   :  { %v1112_v48 = vpop.permute.xlu1 %1111 }
0x1066   :  { %v1114_v49 = vsel %vm218_vm2, %v1112_v48, %v1102_v47 }
0x1067   :  { %1504 = vtanh.f32 %v1114_v49  ;;  %1140 = vst.msk [vmem:[#allocation3] sm:$0x3] %vm54_vm0, %v1114_v49 }
0x1069   :  { %v1135_v50 = vpop.permute.xlu1 %1134 }
0x106a   :  { %v1137_v56 = vsel %vm218_vm2, %v1124_v54, %v1135_v50 }
0x106e   :  { %v1894_v51 = vld [vmem:[#allocation3] sm:$0x3] }
0x106f   :  { %v1225_v52 = vrot.slane %v1894_v51, %v1626_v24 }
0x1071   :  { %v1505_v55 = vpop.eup %1504  ;;  %1226 = vrot.lane.b32.xlu1 %v1225_v52, %s1523_s6 }
0x1072   :  { %v1139_v57 = vmul.f32 %v1505_v55, %v1137_v56 }
0x1074   :  { %1383 = vst.msk [vmem:[%s1980_s3 + $0xc] sm:$0x3] %vm248_vm3, %v1139_v57 }
0x1075   :  { %1141 = vst.msk [vmem:[#allocation2] sm:$0x3] %vm54_vm0, %v1139_v57 }
0x107c   :  { %v1150_v58 = vld [vmem:[#allocation2] sm:$0x3] }
0x107d   :  { %v1152_v59 = vpack.c.bf16 %v1150_v58, %v1150_v58 }
0x107f   :  { %1385 = vmatmul.mubr.msk.bf16.vlgmr.msra.gmra.mrb[12].mxu1 %vm108_vm1, %v1152_v59 }
0x10e3   :  { %v1227_v25 = vpop.permute.xlu1 %1226 }
0x1152   :  { %v1190_v2 = vpop.f32.mrb[12].mxu1 }
0x1153   :  { %v1200_v10 = vadd.f32 %v1199_v61, %v1190_v2  ;;  %v1192_v11 = vpop.f32.mrb[13].mxu1 }
0x1154   :  { %v1203_v12 = vadd.f32 %v1202_v63, %v1192_v11  ;;  %v1194_v13 = vpop.f32.mrb[14].mxu1 }
0x1155   :  { %1506 = vtanh.f32 %v1200_v10  ;;  %v1195_v14 = vpop.f32.mrb[15].mxu1  ;;  %v1387_v18 = vmul.f32 -1.442695, %v1200_v10 }
0x1156   :  { %1508 = vtanh.f32 %v1203_v12  ;;  %v1388_v19 = vmul.f32 -1.442695, %v1203_v12 }
0x1157   :  { %1510 = vpow2.f32 %v1387_v18 }
0x1158   :  { %1512 = vpow2.f32 %v1388_v19 }
0x115f   :  { %v1507_v16 = vpop.eup %1506 }
0x1160   :  { %v1509_v17 = vpop.eup %1508  ;;  %1231 = vrot.lane.b32.xlu0 %v1507_v16, %s1523_s6 }
0x1161   :  { %1242 = vrot.lane.b32.xlu1 %v1509_v17, %s1523_s6  ;;  %v1511_v20 = vpop.eup %1510 }
0x1162   :  { %v1207_v21 = vadd.f32 1.0, %v1511_v20  ;;  %v1513_v22 = vpop.eup %1512 }
0x1163   :  { %v1214_v23 = vadd.f32 1.0, %v1513_v22 }
0x1164   :  { %1514 = vrcp.f32 %v1207_v21 }
0x1165   :  { %1516 = vrcp.f32 %v1214_v23 }
0x116e   :  { %v1515_v26 = vpop.eup %1514 }
0x116f   :  { %v1517_v31 = vpop.eup %1516  ;;  %v1270_v33 = vrot.slane %v1515_v26, %v1626_v24  ;;  %v1229_v1 = vmul.f32 %v1515_v26, %v1227_v25 }
0x1170   :  { %v1281_v35 = vrot.slane %v1517_v31, %v1626_v24 }
0x11d2   :  { %v1232_v27 = vpop.permute.xlu0 %1231 }
0x11d3   :  { %v1234_v28 = vmul.f32 %v1515_v26, %v1232_v27  ;;  %v1243_v29 = vpop.permute.xlu1 %1242 }
0x11d4   :  { %v1245_v32 = vmul.f32 %v1517_v31, %v1243_v29 }
0x11d5   :  { %1236 = vrot.lane.b32.xlu0 %v1234_v28, %s1523_s6 }
0x11d9   :  { %1247 = vrot.lane.b32.xlu0 %v1245_v32, %s1523_s6 }
0x11dd   :  { %1271 = vrot.lane.b32.xlu0 %v1270_v33, %s1525_s10 }
0x11e1   :  { %251 = vrot.lane.b32.xlu0 %v1651_v62, %s1524_s9 }
0x11e5   :  { %549 = vrot.lane.b32.xlu0 %v1739_v45, %s1524_s9 }
0x11e9   :  { %847 = vrot.lane.b32.xlu0 %v1826_v30, %s1524_s9 }
0x11ed   :  { %1145 = vrot.lane.b32.xlu0 %v1139_v57, %s1524_s9 }
0x1247   :  { %v1237_v3 = vpop.permute.xlu0 %1236 }
0x1248   :  { %v1239_v4 = vadd.f32 %v1237_v3, %v1229_v1 }
0x124a   :  { %v1258_v34 = vrot.slane %v1239_v4, %v1626_v24 }
0x124b   :  { %v1248_v5 = vpop.permute.xlu0 %1247 }
0x124c   :  { %1259 = vrot.lane.b32.xlu1 %v1258_v34, %s1524_s9 }
0x124f   :  { %v1272_v6 = vpop.permute.xlu0 %1271 }
0x1250   :  { %1282 = vrot.lane.b32.xlu1 %v1281_v35, %s1524_s9 }
0x1253   :  { %v252_v62 = vpop.permute.xlu0 %251 }
0x1254   :  { %1342 = vst.msk [vmem:[%s1981_s4 + $0xe] sm:$0x3] %vm248_vm3, %v252_v62  ;;  %400 = vrot.lane.b32.xlu1 %v1695_v53, %s1524_s9  ;;  %v1240_v53 = vmul.f32 %v1517_v31, %v1894_v51 }
0x1256   :  { %v1250_v36 = vadd.f32 %v1248_v5, %v1240_v53 }
0x1257   :  { %v550_v45 = vpop.permute.xlu0 %549 }
0x1258   :  { %1356 = vst.msk [vmem:[%s1981_s4 + $0xa] sm:$0x3] %vm248_vm3, %v550_v45  ;;  %698 = vrot.lane.b32.xlu1 %v1783_v37, %s1524_s9 }
0x125b   :  { %v848_v24 = vpop.permute.xlu0 %847 }
0x125c   :  { %1370 = vst.msk [vmem:[%s1981_s4 + $0x6] sm:$0x3] %vm248_vm3, %v848_v24  ;;  %996 = vrot.lane.b32.xlu1 %v1866_v15, %s1524_s9 }
0x125f   :  { %v1146_v30 = vpop.permute.xlu0 %1145 }
0x1260   :  { %1384 = vst.msk [vmem:[%s1981_s4 + $0x2] sm:$0x3] %vm248_vm3, %v1146_v30 }
0x12be   :  { %v1260_v7 = vpop.permute.xlu1 %1259 }
0x12bf   :  { %v1262_v37 = vsel %vm218_vm2, %v1260_v7, %v1250_v36 }
0x12c0   :  { %1518 = vtanh.f32 %v1262_v37  ;;  %1288 = vst.msk [vmem:[#allocation3] sm:$0x3] %vm54_vm0, %v1262_v37 }
0x12c2   :  { %v1283_v8 = vpop.permute.xlu1 %1282 }
0x12c3   :  { %v1285_v38 = vsel %vm218_vm2, %v1272_v6, %v1283_v8 }
0x12c6   :  { %v401_v9 = vpop.permute.xlu1 %400 }
0x12c7   :  { %1349 = vst.msk [vmem:[%s1981_s4 + $0xc] sm:$0x3] %vm248_vm3, %v401_v9 }
0x12ca   :  { %v1519_v15 = vpop.eup %1518  ;;  %v699_v39 = vpop.permute.xlu1 %698 }
0x12cb   :  { %v1287_v40 = vmul.f32 %v1519_v15, %v1285_v38  ;;  %1363 = vst.msk [vmem:[%s1981_s4 + $0x8] sm:$0x3] %vm248_vm3, %v699_v39 }
0x12cd   :  { %1289 = vst.msk [vmem:[#allocation2] sm:$0x3] %vm54_vm0, %v1287_v40  ;;  %1293 = vrot.lane.b32.xlu1 %v1287_v40, %s1524_s9 }
0x12ce   :  { %1389 = vst.msk [vmem:[%s1980_s3 + $0xe] sm:$0x3] %vm248_vm3, %v1287_v40  ;;  %v997_v41 = vpop.permute.xlu1 %996 }
0x12cf   :  { %1377 = vst.msk [vmem:[%s1981_s4 + $0x4] sm:$0x3] %vm248_vm3, %v997_v41 }
0x133f   :  { %v1294_v42 = vpop.permute.xlu1 %1293 }
0x1340   :  { %1296 = vst.msk [vmem:[%s1981_s4] sm:$0x3] %vm248_vm3, %v1294_v42 }

</bundles_post_ra>
